<compile_context>
chip_gen: v5e
topology: v5e:2x2
jax: 0.10.0
libtpu: 0.0.40
codegen_flags: <defaults>
</compile_context>

<pallas_src>
import jax
import jax.numpy as jnp
from jax.experimental import pallas as pl
from jax.experimental.pallas import tpu as pltpu


# ----------------------------- Fused Pallas kernel ---------------------------

def _make_decoder_kernel(num_layers, hidden_dim):
    """Fused multi-timestep decoder kernel (grid axis 0 = decode step)."""
    H = hidden_dim
    L = num_layers

    def kernel(*refs):
        # Flat ref layout:
        #   inputs : tok(T,B,1), emb, (w, b) * L, fc_w_t, fc_b, hidden0, cell0
        #   outputs: pred(T,B,V), h_state(L,B,H), c_state(L,B,H)
        tok_ref, emb_ref = refs[0], refs[1]
        layer_refs = refs[2:2 + 2 * L]
        fcw_ref = refs[2 + 2 * L]
        fcb_ref = refs[3 + 2 * L]
        h_in_ref = refs[4 + 2 * L]
        c_in_ref = refs[5 + 2 * L]
        pred_ref = refs[6 + 2 * L]
        h_ref = refs[7 + 2 * L]          # state carrier (VMEM-resident output)
        c_ref = refs[8 + 2 * L]

        t = pl.program_id(0)

        # Seed the recurrent state from the initial hidden/cell on step 0 only.
        # Afterwards the state lives entirely in the constant-index output
        # blocks (resident in VMEM for the whole grid, written to HBM once).
        @pl.when(t == 0)
        def _():
            h_ref[...] = h_in_ref[...]
            c_ref[...] = c_in_ref[...]

        B = tok_ref.shape[1]
        V = emb_ref.shape[0]

        # Embedding gather as an exact one-hot matmul (padding row 0 is zero in
        # the table, matching padding_idx=0).
        # TODO(synk): at large vocabularies replace with a scalar-prefetch /
        #             Element-indexed row gather; O(B*V*E) is fine at V=256.
        tok = tok_ref[0]                                            # (B, 1) int32
        onehot = (jax.lax.broadcasted_iota(jnp.int32, (B, V), 1) == tok)
        x = jnp.dot(onehot.astype(emb_ref.dtype), emb_ref[...],
                    preferred_element_type=jnp.float32)             # (B, E) f32
        # TODO(synk): dropout on the embedded input is identity (eval mode).

        layer_in = x.astype(jnp.bfloat16)                           # bf16 operand
        for layer in range(L):
            w_ref = layer_refs[2 * layer]                           # (in+H, 4H) bf16
            b_ref = layer_refs[2 * layer + 1]                       # (1, 4H)    f32
            h_prev = h_ref[layer]                                   # (B, H)     f32
            c_prev = c_ref[layer]                                   # (B, H)     f32

            # Single fused gate matmul on [x, h]; K = in_dim + H = 256.
            xh = jnp.concatenate([layer_in, h_prev.astype(jnp.bfloat16)], axis=1)
            gates = (jnp.dot(xh, w_ref[...],
                             preferred_element_type=jnp.float32)
                     + b_ref[...])                                  # (B, 4H) f32

            # Gate columns permuted at init time to [i, f, o | g]:
            # one sigmoid over a 3H slab + one tanh over H.
            sig = jax.nn.sigmoid(gates[:, :3 * H])
            g_g = jnp.tanh(gates[:, 3 * H:])
            i_g = sig[:, :H]
            f_g = sig[:, H:2 * H]
            o_g = sig[:, 2 * H:]

            c_new = f_g * c_prev + i_g * g_g                        # f32 math
            h_new = o_g * jnp.tanh(c_new)

            h_ref[layer] = h_new
            c_ref[layer] = c_new
            layer_in = h_new.astype(jnp.bfloat16)   # inter-layer dropout = identity

        # Output projection: logits = h_top @ fc_W^T + fc_b
        pred_ref[0] = (jnp.dot(layer_in, fcw_ref[...],
                               preferred_element_type=jnp.float32)
                       + fcb_ref[...])

    return kernel


# ------------------------------- Forward passes -------------------------------

def decoder_decode_steps(params, tokens_tb, hidden, cell):
    """Fused T-step decode.

    tokens_tb: (T, B) int32; hidden/cell: (L, B, H) f32.
    Returns (predictions (T, B, V), hidden (L, B, H), cell (L, B, H)).
    Equivalent to calling Decoder.forward T times, threading (hidden, cell).
    """
    T, B = tokens_tb.shape
    L, _, H = hidden.shape
    V, E = params["embedding"].shape

    tokens3 = tokens_tb.reshape(T, B, 1).astype(jnp.int32)

    inputs = [tokens3, params["embedding"]]
    in_specs = [
        pl.BlockSpec((1, B, 1), lambda t: (t, 0, 0)),       # per-step tokens
        pl.BlockSpec((V, E), lambda t: (0, 0)),             # VMEM-resident weights
    ]
    for p in params["lstm"]:
        inputs += [p["w"], p["b"]]
        in_specs += [
            pl.BlockSpec(p["w"].shape, lambda t: (0, 0)),
            pl.BlockSpec(p["b"].shape, lambda t: (0, 0)),
        ]
    inputs += [params["fc_w_t"], params["fc_b"], hidden, cell]
    in_specs += [
        pl.BlockSpec((H, V), lambda t: (0, 0)),
        pl.BlockSpec((1, V), lambda t: (0, 0)),
        pl.BlockSpec((L, B, H), lambda t: (0, 0, 0)),        # read only at t == 0
        pl.BlockSpec((L, B, H), lambda t: (0, 0, 0)),
    ]
    n_in = len(inputs)

    out_shapes = (
        jax.ShapeDtypeStruct((T, B, V), jnp.float32),
        jax.ShapeDtypeStruct((L, B, H), jnp.float32),
        jax.ShapeDtypeStruct((L, B, H), jnp.float32),
    )
    out_specs = [
        pl.BlockSpec((1, B, V), lambda t: (t, 0, 0)),
        pl.BlockSpec((L, B, H), lambda t: (0, 0, 0)),         # resident state
        pl.BlockSpec((L, B, H), lambda t: (0, 0, 0)),
    ]

    # Advisory cost estimate for XLA's scheduler.
    lstm_flops = sum(2 * B * p["w"].shape[0] * (4 * H) for p in params["lstm"])
    flops_per_step = 2 * B * V * E + lstm_flops + 2 * B * H * V
    trans_per_step = 5 * B * H * L
    bytes_in = sum(int(x.size) * x.dtype.itemsize for x in inputs)
    bytes_out = T * B * V * 4 + 2 * L * B * H * 4
    cost = pl.CostEstimate(flops=T * flops_per_step,
                           transcendentals=T * trans_per_step,
                           bytes_accessed=bytes_in + bytes_out)

    pred, h_out, c_out = pl.pallas_call(
        _make_decoder_kernel(L, H),
        out_shape=out_shapes,
        grid_spec=pltpu.PrefetchScalarGridSpec(
            num_scalar_prefetch=0,
            grid=(T,),
            in_specs=in_specs,
            out_specs=out_specs,
        ),
        # In-place update of the recurrent state buffers (hidden -> out 1,
        # cell -> out 2); kernel only reads the input side at t == 0.
        input_output_aliases={n_in - 2: 1, n_in - 1: 2},
        compiler_params=pltpu.CompilerParams(
            dimension_semantics=("arbitrary",)),   # sequential recurrence over T
        cost_estimate=cost,
    )(*inputs)
    return pred, h_out, c_out


def decoder_forward(params, tokens, hidden, cell):
    """Single-step forward matching PyTorch Decoder.forward.

    tokens: (B,) int32; hidden/cell: (L, B, H) f32.
    Returns (prediction (B, V), hidden, cell).
    """
    pred, h_out, c_out = decoder_decode_steps(params, tokens.reshape(1, -1),
                                              hidden, cell)
    return pred[0], h_out, c_out


# ----------------------------- Pure-JAX reference -----------------------------

def decoder_step_ref(params, tokens, hidden, cell):
    """Reference single step using the same (permuted, bf16) parameters."""
    H = hidden.shape[-1]
    emb = params["embedding"].astype(jnp.float32)
    x = emb[tokens]                                              # (B, E) f32
    layer_in = x.astype(jnp.bfloat16)
    h_list, c_list = [], []
    for layer, p in enumerate(params["lstm"]):
        h_prev, c_prev = hidden[layer], cell[layer]
        xh = jnp.concatenate([layer_in, h_prev.astype(jnp.bfloat16)], axis=1)
        gates = jnp.dot(xh, p["w"], preferred_element_type=jnp.float32) + p["b"]
        sig = jax.nn.sigmoid(gates[:, :3 * H])
        g_g = jnp.tanh(gates[:, 3 * H:])
        i_g, f_g, o_g = sig[:, :H], sig[:, H:2 * H], sig[:, 2 * H:]
        c_new = f_g * c_prev + i_g * g_g
        h_new = o_g * jnp.tanh(c_new)
        h_list.append(h_new)
        c_list.append(c_new)
        layer_in = h_new.astype(jnp.bfloat16)
    pred = (jnp.dot(layer_in, params["fc_w_t"],
                    preferred_element_type=jnp.float32) + params["fc_b"])
    return pred, jnp.stack(h_list), jnp.stack(c_list)


# ----------------------------- Parameter setup --------------------------------

def _regroup_gates(a):
    """Permute the 4H gate axis from PyTorch [i, f, g, o] to [i, f, o, g]."""
    i, f, g, o = jnp.split(a, 4, axis=-1)
    return jnp.concatenate([i, f, o, g], axis=-1)


def init_decoder_params(key, vocab_size, embed_dim, hidden_dim, num_layers):
    params = {}
    k_emb, k_lstm, k_fc = jax.random.split(key, 3)

    emb = 0.02 * jax.random.normal(k_emb, (vocab_size, embed_dim), jnp.float32)
    emb = emb.at[0].set(0.0)                      # padding_idx=0
    params["embedding"] = emb.astype(jnp.bfloat16)

    lstm_layers = []
    keys = jax.random.split(k_lstm, num_layers)
    scale = 1.0 / jnp.sqrt(hidden_dim)
    for layer in range(num_layers):
        in_dim = embed_dim if layer == 0 else hidden_dim
        k1, k2, k3, k4 = jax.random.split(keys[layer], 4)
        w_ih = scale * jax.random.normal(k1, (4 * hidden_dim, in_dim), jnp.float32)
        w_hh = scale * jax.random.normal(k2, (4 * hidden_dim, hidden_dim), jnp.float32)
        b_ih = scale * jax.random.normal(k3, (4 * hidden_dim,), jnp.float32)
        b_hh = scale * jax.random.normal(k4, (4 * hidden_dim,), jnp.float32)
        # Stack [W_ih^T ; W_hh^T] -> (in_dim + H, 4H), permute gate columns to
        # [i, f, o, g], store bf16.  Bias combined (exact) and permuted, f32.
        w = jnp.concatenate([jnp.transpose(w_ih), jnp.transpose(w_hh)], axis=0)
        lstm_layers.append({
            "w": _regroup_gates(w).astype(jnp.bfloat16),                 # (in+H, 4H)
            "b": _regroup_gates((b_ih + b_hh).reshape(1, 4 * hidden_dim)),  # f32
        })
    params["lstm"] = lstm_layers

    kf1, kf2 = jax.random.split(k_fc)
    fc_scale = 1.0 / jnp.sqrt(hidden_dim)
    w_fc = fc_scale * jax.random.normal(kf1, (vocab_size, hidden_dim), jnp.float32)
    b_fc = fc_scale * jax.random.normal(kf2, (vocab_size,), jnp.float32)
    params["fc_w_t"] = jnp.transpose(w_fc).astype(jnp.bfloat16)   # (H, V)
    params["fc_b"] = b_fc.reshape(1, vocab_size)                  # f32
    return params


# ---------------------------------- Main ---------------------------------------

if __name__ == "__main__":
    vocab_size = 256
    embed_dim = 128
    hidden_dim = 128
    num_layers = 2
    batch = 8          # throughput scales ~linearly with batch up to ~128 rows
    steps = 8          # fused decode timesteps (weights DMA'd once for all 8)

    key = jax.random.PRNGKey(0)
    k_params, k_tok, k_h, k_c = jax.random.split(key, 4)

    params = init_decoder_params(k_params, vocab_size, embed_dim,
                                 hidden_dim, num_layers)

    tokens_seq = jax.random.randint(k_tok, (steps, batch), 0, vocab_size,
                                    dtype=jnp.int32)
    hidden = 0.1 * jax.random.normal(k_h, (num_layers, batch, hidden_dim),
                                     jnp.float32)
    cell = 0.1 * jax.random.normal(k_c, (num_layers, batch, hidden_dim),
                                   jnp.float32)

    # ---- 1) Single-step forward (exact Decoder.forward semantics) ----
    step_fn = jax.jit(decoder_forward)
    pred, h1, c1 = step_fn(params, tokens_seq[0], hidden, cell)
    jax.block_until_ready((pred, h1, c1))

    assert pred.shape == (batch, vocab_size) and pred.dtype == jnp.float32
    assert h1.shape == (num_layers, batch, hidden_dim)
    assert c1.shape == (num_layers, batch, hidden_dim)

    pred_r, h_r, c_r = decoder_step_ref(params, tokens_seq[0], hidden, cell)
    assert bool(jnp.allclose(pred, pred_r, atol=2e-2, rtol=2e-2))
    assert bool(jnp.allclose(h1, h_r, atol=2e-2, rtol=2e-2))
    assert bool(jnp.allclose(c1, c_r, atol=2e-2, rtol=2e-2))

    # ---- 2) Fused multi-step decode (grid over T, VMEM-resident weights) ----
    fused_fn = jax.jit(decoder_decode_steps)
    preds, hT, cT = fused_fn(params, tokens_seq, hidden, cell)
    jax.block_until_ready((preds, hT, cT))

    assert preds.shape == (steps, batch, vocab_size)
    assert hT.shape == (num_layers, batch, hidden_dim)
    assert cT.shape == (num_layers, batch, hidden_dim)

    h_s, c_s = hidden, cell
    for t in range(steps):
        p_t, h_s, c_s = decoder_step_ref(params, tokens_seq[t], h_s, c_s)
    assert bool(jnp.allclose(preds[-1], p_t, atol=5e-2, rtol=5e-2))
    assert bool(jnp.allclose(hT, h_s, atol=5e-2, rtol=5e-2))
    assert bool(jnp.allclose(cT, c_s, atol=5e-2, rtol=5e-2))
    assert bool(jnp.all(jnp.isfinite(preds)))

    print("KERNEL_OK")
</pallas_src>

<mosaic_0001>
module attributes {stable_mosaic.version = 11 : i64} {
  func.func @kernel(%arg0: i32, %arg1: memref<1x8x1xi32, #tpu.memory_space<vmem>>, %arg2: memref<256x128xbf16, #tpu.memory_space<vmem>>, %arg3: memref<256x512xbf16, #tpu.memory_space<vmem>>, %arg4: memref<1x512xf32, #tpu.memory_space<vmem>>, %arg5: memref<256x512xbf16, #tpu.memory_space<vmem>>, %arg6: memref<1x512xf32, #tpu.memory_space<vmem>>, %arg7: memref<128x256xbf16, #tpu.memory_space<vmem>>, %arg8: memref<1x256xf32, #tpu.memory_space<vmem>>, %arg9: memref<2x8x128xf32, #tpu.memory_space<vmem>>, %arg10: memref<2x8x128xf32, #tpu.memory_space<vmem>>, %arg11: memref<1x8x256xf32, #tpu.memory_space<vmem>>, %arg12: memref<2x8x128xf32, #tpu.memory_space<vmem>>, %arg13: memref<2x8x128xf32, #tpu.memory_space<vmem>>) attributes {dimension_semantics = [#tpu.dimension_semantics<arbitrary>], iteration_bounds = array<i64: 1>, scalar_prefetch = 0 : i64, scratch_operands = 0 : i64, tpu.core_type = #tpu.core_type<tc>, window_params = [{transform_indices = @transform_0, window_bounds = array<i64: 1, 8, 1>}, {pipeline_mode = #tpu.pipeline_mode<synchronous>, transform_indices = @transform_1, window_bounds = array<i64: 256, 128>}, {pipeline_mode = #tpu.pipeline_mode<synchronous>, transform_indices = @transform_2, window_bounds = array<i64: 256, 512>}, {pipeline_mode = #tpu.pipeline_mode<synchronous>, transform_indices = @transform_3, window_bounds = array<i64: 1, 512>}, {pipeline_mode = #tpu.pipeline_mode<synchronous>, transform_indices = @transform_4, window_bounds = array<i64: 256, 512>}, {pipeline_mode = #tpu.pipeline_mode<synchronous>, transform_indices = @transform_5, window_bounds = array<i64: 1, 512>}, {pipeline_mode = #tpu.pipeline_mode<synchronous>, transform_indices = @transform_6, window_bounds = array<i64: 128, 256>}, {pipeline_mode = #tpu.pipeline_mode<synchronous>, transform_indices = @transform_7, window_bounds = array<i64: 1, 256>}, {pipeline_mode = #tpu.pipeline_mode<synchronous>, transform_indices = @transform_8, window_bounds = array<i64: 2, 8, 128>}, {pipeline_mode = #tpu.pipeline_mode<synchronous>, transform_indices = @transform_9, window_bounds = array<i64: 2, 8, 128>}, {transform_indices = @transform_10, window_bounds = array<i64: 1, 8, 256>}, {pipeline_mode = #tpu.pipeline_mode<synchronous>, transform_indices = @transform_11, window_bounds = array<i64: 2, 8, 128>}, {pipeline_mode = #tpu.pipeline_mode<synchronous>, transform_indices = @transform_12, window_bounds = array<i64: 2, 8, 128>}]} {
    %c0_i32 = arith.constant 0 : i32
    %0 = arith.cmpi eq, %arg0, %c0_i32 : i32
    %1 = arith.extui %0 : i1 to i32
    %c0_i32_0 = arith.constant 0 : i32
    %2 = arith.cmpi ne, %1, %c0_i32_0 : i32
    scf.if %2 {
      %c0_48 = arith.constant 0 : index
      %c0_49 = arith.constant 0 : index
      %c0_50 = arith.constant 0 : index
      %90 = vector.load %arg9[%c0_48, %c0_49, %c0_50] : memref<2x8x128xf32, #tpu.memory_space<vmem>>, vector<2x8x128xf32>
      %c0_51 = arith.constant 0 : index
      %c0_52 = arith.constant 0 : index
      %c0_53 = arith.constant 0 : index
      %91 = vector.load %arg12[%c0_51, %c0_52, %c0_53] : memref<2x8x128xf32, #tpu.memory_space<vmem>>, vector<2x8x128xf32>
      tpu.vector_store %arg12[%c0_51, %c0_52, %c0_53], %90 {strides = array<i32>} : memref<2x8x128xf32, #tpu.memory_space<vmem>>, vector<2x8x128xf32>,
      %c0_54 = arith.constant 0 : index
      %c0_55 = arith.constant 0 : index
      %c0_56 = arith.constant 0 : index
      %92 = vector.load %arg10[%c0_54, %c0_55, %c0_56] : memref<2x8x128xf32, #tpu.memory_space<vmem>>, vector<2x8x128xf32>
      %c0_57 = arith.constant 0 : index
      %c0_58 = arith.constant 0 : index
      %c0_59 = arith.constant 0 : index
      %93 = vector.load %arg13[%c0_57, %c0_58, %c0_59] : memref<2x8x128xf32, #tpu.memory_space<vmem>>, vector<2x8x128xf32>
      tpu.vector_store %arg13[%c0_57, %c0_58, %c0_59], %92 {strides = array<i32>} : memref<2x8x128xf32, #tpu.memory_space<vmem>>, vector<2x8x128xf32>,
    } else {
    }
    %c0 = arith.constant 0 : index
    %c0_1 = arith.constant 0 : index
    %c0_2 = arith.constant 0 : index
    %3 = vector.load %arg1[%c0, %c0_1, %c0_2] : memref<1x8x1xi32, #tpu.memory_space<vmem>>, vector<1x8x1xi32>
    %4 = vector.shape_cast %3 : vector<1x8x1xi32> to vector<8x1xi32>
    %5 = tpu.iota {dimensions = array<i32: 1>} : vector<8x256xi32>
    %6 = vector.broadcast %4 : vector<8x1xi32> to vector<8x256xi32>
    %7 = arith.cmpi eq, %5, %6 : vector<8x256xi32>
    %8 = arith.extui %7 : vector<8x256xi1> to vector<8x256xi32>
    %9 = arith.sitofp %8 : vector<8x256xi32> to vector<8x256xf32>
    %10 = arith.truncf %9 : vector<8x256xf32> to vector<8x256xbf16>
    %c0_3 = arith.constant 0 : index
    %c0_4 = arith.constant 0 : index
    %11 = vector.load %arg2[%c0_3, %c0_4] : memref<256x128xbf16, #tpu.memory_space<vmem>>, vector<256x128xbf16>
    %cst = arith.constant dense<0.000000e+00> : vector<8x128xf32>
    %12 = tpu.matmul %10, %11, %cst {dimension_numbers = #tpu.dot_dimension_numbers<[1], [0], [0], [1], [0, 0, 1, 1], [], []>} : vector<8x256xbf16>, vector<256x128xbf16>, vector<8x128xf32> -> vector<8x128xf32>
    %13 = arith.truncf %12 : vector<8x128xf32> to vector<8x128xbf16>
    %c0_5 = arith.constant 0 : index
    %c0_6 = arith.constant 0 : index
    %c0_7 = arith.constant 0 : index
    %14 = vector.load %arg12[%c0_5, %c0_6, %c0_7] : memref<2x8x128xf32, #tpu.memory_space<vmem>>, vector<1x8x128xf32>
    %15 = vector.shape_cast %14 : vector<1x8x128xf32> to vector<8x128xf32>
    %c0_8 = arith.constant 0 : index
    %c0_9 = arith.constant 0 : index
    %c0_10 = arith.constant 0 : index
    %16 = vector.load %arg13[%c0_8, %c0_9, %c0_10] : memref<2x8x128xf32, #tpu.memory_space<vmem>>, vector<1x8x128xf32>
    %17 = vector.shape_cast %16 : vector<1x8x128xf32> to vector<8x128xf32>
    %18 = arith.truncf %15 : vector<8x128xf32> to vector<8x128xbf16>
    %19 = tpu.concatenate %13, %18 in 1 : vector<8x128xbf16>, vector<8x128xbf16> -> vector<8x256xbf16>
    %c0_11 = arith.constant 0 : index
    %c0_12 = arith.constant 0 : index
    %20 = vector.load %arg3[%c0_11, %c0_12] : memref<256x512xbf16, #tpu.memory_space<vmem>>, vector<256x512xbf16>
    %cst_13 = arith.constant dense<0.000000e+00> : vector<8x512xf32>
    %21 = tpu.matmul %19, %20, %cst_13 {dimension_numbers = #tpu.dot_dimension_numbers<[1], [0], [0], [1], [0, 0, 1, 1], [], []>} : vector<8x256xbf16>, vector<256x512xbf16>, vector<8x512xf32> -> vector<8x512xf32>
    %c0_14 = arith.constant 0 : index
    %c0_15 = arith.constant 0 : index
    %22 = vector.load %arg4[%c0_14, %c0_15] : memref<1x512xf32, #tpu.memory_space<vmem>>, vector<1x512xf32>
    %23 = vector.broadcast %22 : vector<1x512xf32> to vector<8x512xf32>
    %24 = arith.addf %21, %23 : vector<8x512xf32>
    %25 = vector.extract_strided_slice %24 {offsets = [0, 0], sizes = [8, 384], strides = [1, 1]} : vector<8x512xf32> to vector<8x384xf32>
    %26 = arith.negf %25 : vector<8x384xf32>
    %27 = math.exp %26 : vector<8x384xf32>
    %cst_16 = arith.constant 1.000000e+00 : f32
    %28 = vector.broadcast %cst_16 : f32 to vector<8x384xf32>
    %29 = arith.addf %28, %27 : vector<8x384xf32>
    %30 = arith.divf %28, %29 : vector<8x384xf32>
    %31 = vector.extract_strided_slice %24 {offsets = [0, 384], sizes = [8, 128], strides = [1, 1]} : vector<8x512xf32> to vector<8x128xf32>
    %32 = math.tanh %31 : vector<8x128xf32>
    %33 = vector.extract_strided_slice %30 {offsets = [0, 0], sizes = [8, 128], strides = [1, 1]} : vector<8x384xf32> to vector<8x128xf32>
    %34 = vector.extract_strided_slice %30 {offsets = [0, 128], sizes = [8, 128], strides = [1, 1]} : vector<8x384xf32> to vector<8x128xf32>
    %35 = vector.extract_strided_slice %30 {offsets = [0, 256], sizes = [8, 128], strides = [1, 1]} : vector<8x384xf32> to vector<8x128xf32>
    %36 = arith.mulf %34, %17 : vector<8x128xf32>
    %37 = arith.mulf %33, %32 : vector<8x128xf32>
    %38 = arith.addf %36, %37 : vector<8x128xf32>
    %39 = math.tanh %38 : vector<8x128xf32>
    %40 = arith.mulf %35, %39 : vector<8x128xf32>
    %c0_17 = arith.constant 0 : index
    %c0_18 = arith.constant 0 : index
    %c0_19 = arith.constant 0 : index
    %41 = vector.load %arg12[%c0_17, %c0_18, %c0_19] : memref<2x8x128xf32, #tpu.memory_space<vmem>>, vector<1x8x128xf32>
    %42 = vector.shape_cast %41 : vector<1x8x128xf32> to vector<8x128xf32>
    %43 = vector.shape_cast %40 : vector<8x128xf32> to vector<1x8x128xf32>
    tpu.vector_store %arg12[%c0_17, %c0_18, %c0_19], %43 {strides = array<i32>} : memref<2x8x128xf32, #tpu.memory_space<vmem>>, vector<1x8x128xf32>,
    %c0_20 = arith.constant 0 : index
    %c0_21 = arith.constant 0 : index
    %c0_22 = arith.constant 0 : index
    %44 = vector.load %arg13[%c0_20, %c0_21, %c0_22] : memref<2x8x128xf32, #tpu.memory_space<vmem>>, vector<1x8x128xf32>
    %45 = vector.shape_cast %44 : vector<1x8x128xf32> to vector<8x128xf32>
    %46 = vector.shape_cast %38 : vector<8x128xf32> to vector<1x8x128xf32>
    tpu.vector_store %arg13[%c0_20, %c0_21, %c0_22], %46 {strides = array<i32>} : memref<2x8x128xf32, #tpu.memory_space<vmem>>, vector<1x8x128xf32>,
    %47 = arith.truncf %40 : vector<8x128xf32> to vector<8x128xbf16>
    %c1 = arith.constant 1 : index
    %c0_23 = arith.constant 0 : index
    %c0_24 = arith.constant 0 : index
    %48 = vector.load %arg12[%c1, %c0_23, %c0_24] : memref<2x8x128xf32, #tpu.memory_space<vmem>>, vector<1x8x128xf32>
    %49 = vector.shape_cast %48 : vector<1x8x128xf32> to vector<8x128xf32>
    %c1_25 = arith.constant 1 : index
    %c0_26 = arith.constant 0 : index
    %c0_27 = arith.constant 0 : index
    %50 = vector.load %arg13[%c1_25, %c0_26, %c0_27] : memref<2x8x128xf32, #tpu.memory_space<vmem>>, vector<1x8x128xf32>
    %51 = vector.shape_cast %50 : vector<1x8x128xf32> to vector<8x128xf32>
    %52 = arith.truncf %49 : vector<8x128xf32> to vector<8x128xbf16>
    %53 = tpu.concatenate %47, %52 in 1 : vector<8x128xbf16>, vector<8x128xbf16> -> vector<8x256xbf16>
    %c0_28 = arith.constant 0 : index
    %c0_29 = arith.constant 0 : index
    %54 = vector.load %arg5[%c0_28, %c0_29] : memref<256x512xbf16, #tpu.memory_space<vmem>>, vector<256x512xbf16>
    %cst_30 = arith.constant dense<0.000000e+00> : vector<8x512xf32>
    %55 = tpu.matmul %53, %54, %cst_30 {dimension_numbers = #tpu.dot_dimension_numbers<[1], [0], [0], [1], [0, 0, 1, 1], [], []>} : vector<8x256xbf16>, vector<256x512xbf16>, vector<8x512xf32> -> vector<8x512xf32>
    %c0_31 = arith.constant 0 : index
    %c0_32 = arith.constant 0 : index
    %56 = vector.load %arg6[%c0_31, %c0_32] : memref<1x512xf32, #tpu.memory_space<vmem>>, vector<1x512xf32>
    %57 = vector.broadcast %56 : vector<1x512xf32> to vector<8x512xf32>
    %58 = arith.addf %55, %57 : vector<8x512xf32>
    %59 = vector.extract_strided_slice %58 {offsets = [0, 0], sizes = [8, 384], strides = [1, 1]} : vector<8x512xf32> to vector<8x384xf32>
    %60 = arith.negf %59 : vector<8x384xf32>
    %61 = math.exp %60 : vector<8x384xf32>
    %cst_33 = arith.constant 1.000000e+00 : f32
    %62 = vector.broadcast %cst_33 : f32 to vector<8x384xf32>
    %63 = arith.addf %62, %61 : vector<8x384xf32>
    %64 = arith.divf %62, %63 : vector<8x384xf32>
    %65 = vector.extract_strided_slice %58 {offsets = [0, 384], sizes = [8, 128], strides = [1, 1]} : vector<8x512xf32> to vector<8x128xf32>
    %66 = math.tanh %65 : vector<8x128xf32>
    %67 = vector.extract_strided_slice %64 {offsets = [0, 0], sizes = [8, 128], strides = [1, 1]} : vector<8x384xf32> to vector<8x128xf32>
    %68 = vector.extract_strided_slice %64 {offsets = [0, 128], sizes = [8, 128], strides = [1, 1]} : vector<8x384xf32> to vector<8x128xf32>
    %69 = vector.extract_strided_slice %64 {offsets = [0, 256], sizes = [8, 128], strides = [1, 1]} : vector<8x384xf32> to vector<8x128xf32>
    %70 = arith.mulf %68, %51 : vector<8x128xf32>
    %71 = arith.mulf %67, %66 : vector<8x128xf32>
    %72 = arith.addf %70, %71 : vector<8x128xf32>
    %73 = math.tanh %72 : vector<8x128xf32>
    %74 = arith.mulf %69, %73 : vector<8x128xf32>
    %c1_34 = arith.constant 1 : index
    %c0_35 = arith.constant 0 : index
    %c0_36 = arith.constant 0 : index
    %75 = vector.load %arg12[%c1_34, %c0_35, %c0_36] : memref<2x8x128xf32, #tpu.memory_space<vmem>>, vector<1x8x128xf32>
    %76 = vector.shape_cast %75 : vector<1x8x128xf32> to vector<8x128xf32>
    %77 = vector.shape_cast %74 : vector<8x128xf32> to vector<1x8x128xf32>
    tpu.vector_store %arg12[%c1_34, %c0_35, %c0_36], %77 {strides = array<i32>} : memref<2x8x128xf32, #tpu.memory_space<vmem>>, vector<1x8x128xf32>,
    %c1_37 = arith.constant 1 : index
    %c0_38 = arith.constant 0 : index
    %c0_39 = arith.constant 0 : index
    %78 = vector.load %arg13[%c1_37, %c0_38, %c0_39] : memref<2x8x128xf32, #tpu.memory_space<vmem>>, vector<1x8x128xf32>
    %79 = vector.shape_cast %78 : vector<1x8x128xf32> to vector<8x128xf32>
    %80 = vector.shape_cast %72 : vector<8x128xf32> to vector<1x8x128xf32>
    tpu.vector_store %arg13[%c1_37, %c0_38, %c0_39], %80 {strides = array<i32>} : memref<2x8x128xf32, #tpu.memory_space<vmem>>, vector<1x8x128xf32>,
    %81 = arith.truncf %74 : vector<8x128xf32> to vector<8x128xbf16>
    %c0_40 = arith.constant 0 : index
    %c0_41 = arith.constant 0 : index
    %82 = vector.load %arg7[%c0_40, %c0_41] : memref<128x256xbf16, #tpu.memory_space<vmem>>, vector<128x256xbf16>
    %cst_42 = arith.constant dense<0.000000e+00> : vector<8x256xf32>
    %83 = tpu.matmul %81, %82, %cst_42 {dimension_numbers = #tpu.dot_dimension_numbers<[1], [0], [0], [1], [0, 0, 1, 1], [], []>} : vector<8x128xbf16>, vector<128x256xbf16>, vector<8x256xf32> -> vector<8x256xf32>
    %c0_43 = arith.constant 0 : index
    %c0_44 = arith.constant 0 : index
    %84 = vector.load %arg8[%c0_43, %c0_44] : memref<1x256xf32, #tpu.memory_space<vmem>>, vector<1x256xf32>
    %85 = vector.broadcast %84 : vector<1x256xf32> to vector<8x256xf32>
    %86 = arith.addf %83, %85 : vector<8x256xf32>
    %c0_45 = arith.constant 0 : index
    %c0_46 = arith.constant 0 : index
    %c0_47 = arith.constant 0 : index
    %87 = vector.load %arg11[%c0_45, %c0_46, %c0_47] : memref<1x8x256xf32, #tpu.memory_space<vmem>>, vector<1x8x256xf32>
    %88 = vector.shape_cast %87 : vector<1x8x256xf32> to vector<8x256xf32>
    %89 = vector.shape_cast %86 : vector<8x256xf32> to vector<1x8x256xf32>
    tpu.vector_store %arg11[%c0_45, %c0_46, %c0_47], %89 {strides = array<i32>} : memref<1x8x256xf32, #tpu.memory_space<vmem>>, vector<1x8x256xf32>,
    return
  }
  func.func @transform_0(%arg0: i32) -> (i32, i32, i32) {
    %c0_i32 = arith.constant 0 : i32
    %c0_i32_0 = arith.constant 0 : i32
    %c0_i32_1 = arith.constant 0 : i32
    return %arg0, %c0_i32, %c0_i32_0 : i32, i32, i32
  }
  func.func @transform_1(%arg0: i32) -> (i32, i32) {
    %c0_i32 = arith.constant 0 : i32
    %c0_i32_0 = arith.constant 0 : i32
    %c0_i32_1 = arith.constant 0 : i32
    return %c0_i32, %c0_i32_0 : i32, i32
  }
  func.func @transform_2(%arg0: i32) -> (i32, i32) {
    %c0_i32 = arith.constant 0 : i32
    %c0_i32_0 = arith.constant 0 : i32
    %c0_i32_1 = arith.constant 0 : i32
    return %c0_i32, %c0_i32_0 : i32, i32
  }
  func.func @transform_3(%arg0: i32) -> (i32, i32) {
    %c0_i32 = arith.constant 0 : i32
    %c0_i32_0 = arith.constant 0 : i32
    %c0_i32_1 = arith.constant 0 : i32
    return %c0_i32, %c0_i32_0 : i32, i32
  }
  func.func @transform_4(%arg0: i32) -> (i32, i32) {
    %c0_i32 = arith.constant 0 : i32
    %c0_i32_0 = arith.constant 0 : i32
    %c0_i32_1 = arith.constant 0 : i32
    return %c0_i32, %c0_i32_0 : i32, i32
  }
  func.func @transform_5(%arg0: i32) -> (i32, i32) {
    %c0_i32 = arith.constant 0 : i32
    %c0_i32_0 = arith.constant 0 : i32
    %c0_i32_1 = arith.constant 0 : i32
    return %c0_i32, %c0_i32_0 : i32, i32
  }
  func.func @transform_6(%arg0: i32) -> (i32, i32) {
    %c0_i32 = arith.constant 0 : i32
    %c0_i32_0 = arith.constant 0 : i32
    %c0_i32_1 = arith.constant 0 : i32
    return %c0_i32, %c0_i32_0 : i32, i32
  }
  func.func @transform_7(%arg0: i32) -> (i32, i32) {
    %c0_i32 = arith.constant 0 : i32
    %c0_i32_0 = arith.constant 0 : i32
    %c0_i32_1 = arith.constant 0 : i32
    return %c0_i32, %c0_i32_0 : i32, i32
  }
  func.func @transform_8(%arg0: i32) -> (i32, i32, i32) {
    %c0_i32 = arith.constant 0 : i32
    %c0_i32_0 = arith.constant 0 : i32
    %c0_i32_1 = arith.constant 0 : i32
    %c0_i32_2 = arith.constant 0 : i32
    return %c0_i32, %c0_i32_0, %c0_i32_1 : i32, i32, i32
  }
  func.func @transform_9(%arg0: i32) -> (i32, i32, i32) {
    %c0_i32 = arith.constant 0 : i32
    %c0_i32_0 = arith.constant 0 : i32
    %c0_i32_1 = arith.constant 0 : i32
    %c0_i32_2 = arith.constant 0 : i32
    return %c0_i32, %c0_i32_0, %c0_i32_1 : i32, i32, i32
  }
  func.func @transform_10(%arg0: i32) -> (i32, i32, i32) {
    %c0_i32 = arith.constant 0 : i32
    %c0_i32_0 = arith.constant 0 : i32
    %c0_i32_1 = arith.constant 0 : i32
    return %arg0, %c0_i32, %c0_i32_0 : i32, i32, i32
  }
  func.func @transform_11(%arg0: i32) -> (i32, i32, i32) {
    %c0_i32 = arith.constant 0 : i32
    %c0_i32_0 = arith.constant 0 : i32
    %c0_i32_1 = arith.constant 0 : i32
    %c0_i32_2 = arith.constant 0 : i32
    return %c0_i32, %c0_i32_0, %c0_i32_1 : i32, i32, i32
  }
  func.func @transform_12(%arg0: i32) -> (i32, i32, i32) {
    %c0_i32 = arith.constant 0 : i32
    %c0_i32_0 = arith.constant 0 : i32
    %c0_i32_1 = arith.constant 0 : i32
    %c0_i32_2 = arith.constant 0 : i32
    return %c0_i32, %c0_i32_0, %c0_i32_1 : i32, i32, i32
  }
}

</mosaic_0001>

<bundles_post_ra>
// kernel: decoder_forward.1
= control target key start
LH: loop header
LB: loop body
LE: loop exit
PB: predicated region body
PF: predicated region fallthrough
CT: control target
= control target key end

     0   :  { %18 = vsyncpa [#allocation3], 0  ;;  %s2796_s0 = inlined_call_operand.vmem [shape: s32[1,8,1], index: 0, kind: input, shape index: {}]   ;;  %s2797_s1 = inlined_call_operand.hbm [shape: bf16[256,128], index: 1, kind: input, shape index: {}]   ;;  %s2798_s2 = inlined_call_operand.hbm [shape: bf16[256,512], index: 2, kind: input, shape index: {}]   ;;  %s2799_s3 = inlined_call_operand.vmem [shape: f32[1,512], index: 3, kind: input, shape index: {}]   ;;  %s2800_s4 = inlined_call_operand.hbm [shape: bf16[256,512], index: 4, kind: input, shape index: {}]   ;;  %s2801_s5 = inlined_call_operand.vmem [shape: f32[1,512], index: 5, kind: input, shape index: {}]   ;;  %s2802_s6 = inlined_call_operand.hbm [shape: bf16[128,256], index: 6, kind: input, shape index: {}]   ;;  %s2803_s7 = inlined_call_operand.vmem [shape: f32[1,256], index: 7, kind: input, shape index: {}]   ;;  %s2804_s8 = inlined_call_operand.vmem [shape: f32[2,8,128], index: 8, kind: input, shape index: {}, may-alias: {8,11}]   ;;  %s2805_s9 = inlined_call_operand.vmem [shape: f32[2,8,128], index: 9, kind: input, shape index: {}, may-alias: {9,12}]   ;;  %s2806_s10 = inlined_call_operand.hbm [shape: f32[1,8,256], index: 10, kind: output, shape index: {0}]   ;;  %s2807_s11 = inlined_call_operand.vmem [shape: f32[2,8,128], index: 11, kind: output, shape index: {1}, may-alias: {8,11}]   ;;  %s2808_s12 = inlined_call_operand.vmem [shape: f32[2,8,128], index: 12, kind: output, shape index: {2}, may-alias: {9,12}]  }
   0x1   :  { %19 = vsyncpa [#allocation6], 0 }
   0x2   :  { %20 = vsyncpa [#allocation9], 0  ;;  %s41_s23 = sshll.u32 %s2798_s2, 4  ;;  %s42_s23 = int_to_ptr.hbm [resolvable:$true] %s41_s23 }
   0x3   :  { %21 = vsyncpa [#allocation4], 0  ;;  %s2567_s24 = smov [#allocation5]   ;;  %s28_s28 = sshll.u32 %s2797_s1, 4  ;;  %s29_s28 = int_to_ptr.hbm [resolvable:$true] %s28_s28 }
   0x4   :  { %s43_s25 = sshll.u32 %s2567_s24, 4  ;;  %s2568_s29 = smov 256   ;;  %s44_s25 = int_to_ptr.vmem [resolvable:$true] %s43_s25 }
   0x5   :  { %s2569_s30 = smov 16   ;;  %s2570_s13 = smov [#allocation2]  }
   0x6   :  { %49 = dma.hbm_to_vmem [thread:$0]  %s42_s23, 8192, %s44_s25, [#allocation6], %s2568_s29, %s2568_s29, %s2569_s30  }
   0x7   :  { %s30_s14 = sshll.u32 %s2570_s13, 4  ;;  %s2571_s15 = smov 64   ;;  %s31_s14 = int_to_ptr.vmem [resolvable:$true] %s30_s14 }
   0x8   :  { %s2572_s16 = smov 4   ;;  %s56_s18 = sshll.u32 %s2800_s4, 4  ;;  %s57_s18 = int_to_ptr.hbm [resolvable:$true] %s56_s18 }
   0x9   :  { %36 = dma.hbm_to_vmem [thread:$0]  %s29_s28, 2048, %s31_s14, [#allocation3], %s2571_s15, %s2571_s15, %s2572_s16  }
   0xa   :  { %s2573_s19 = smov [#allocation7]   ;;  %s71_s22 = sshll.u32 %s2802_s6, 4  ;;  %s72_s22 = int_to_ptr.hbm [resolvable:$true] %s71_s22 }
   0xb   :  { %s58_s20 = sshll.u32 %s2573_s19, 4  ;;  %s2574_s23 = smov [#allocation8]   ;;  %s59_s20 = int_to_ptr.vmem [resolvable:$true] %s58_s20 }
   0xc   :  { %64 = dma.hbm_to_vmem [thread:$0]  %s57_s18, 8192, %s59_s20, [#allocation6], %s2568_s29, %s2568_s29, %s2569_s30  }
   0xd   :  { %s73_s24 = sshll.u32 %s2574_s23, 4  ;;  %s2575_s25 = smov 128   ;;  %s74_s24 = int_to_ptr.vmem [resolvable:$true] %s73_s24 }
   0xe   :  { %s2576_s26 = smov 8  }
   0xf   :  { %79 = dma.hbm_to_vmem [thread:$0]  %s72_s22, 2048, %s74_s24, [#allocation9], %s2575_s25, %s2575_s25, %s2576_s26  }
  0x10   :  { %2559 = dma.done.wait [#allocation3], 2048  }
  0x11   :  { %2560 = vsyncadd [#allocation3], 4294965248 }
  0x12   :  { %2561 = dma.done.wait [#allocation6], 16384  }
  0x13   :  { %2562 = vsyncadd [#allocation6], 4294950912 }
  0x14   :  { %2563 = dma.done.wait [#allocation9], 2048  }
  0x15   :  { %2564 = vsyncadd [#allocation9], 4294965248  ;;  %v2577_v0 = vmov 0   ;;  %v114_v1 = vld [vmem:[%s2796_s0] sm:$0xff]  ;;  %v2240_v2 = vld [vmem:[#allocation2 + $0x38] sm:$0xff]  ;;  %s2579_s23 = smov [#allocation10]  }
  0x16   :  { %2406 = vset.pattern.permute.xlu0 %v2577_v0  ;;  %v2248_v3 = vld [vmem:[#allocation2 + $0x78] sm:$0xff]  ;;  %257 = vmatpush.bf16.msra.mxu0 %v2240_v2  ;;  %v2239_v4 = vld [vmem:[#allocation2 + $0x30] sm:$0xff]  ;;  %v2238_v6 = vld [vmem:[#allocation2 + $0x28] sm:$0xff]  ;;  %s1555_s24 = sshll.u32 %s2579_s23, 4  ;;  %s1557_s4 = sshll.u32 %s2806_s10, 4  ;;  %s1556_s24 = int_to_ptr.vmem [resolvable:$true] %s1555_s24  ;;  %s1558_s4 = int_to_ptr.hbm [resolvable:$true] %s1557_s4 }
  0x17   :  { %119 = vperm.xlu0 %2406, %v114_v1   ;;  %270 = vmatpush.bf16.msra.mxu1 %v2248_v3  ;;  %v2247_v5 = vld [vmem:[#allocation2 + $0x70] sm:$0xff]  ;;  %v2246_v7 = vld [vmem:[#allocation2 + $0x68] sm:$0xff]  ;;  %v2237_v8 = vld [vmem:[#allocation2 + $0x20] sm:$0xff] }
  0x18   :  { %v2245_v9 = vld [vmem:[#allocation2 + $0x60] sm:$0xff]  ;;  %v2236_v10 = vld [vmem:[#allocation2 + $0x18] sm:$0xff]  ;;  %v2235_v12 = vld [vmem:[#allocation2 + $0x10] sm:$0xff] }
  0x19   :  { %v2244_v11 = vld [vmem:[#allocation2 + $0x58] sm:$0xff]  ;;  %v2243_v13 = vld [vmem:[#allocation2 + $0x50] sm:$0xff]  ;;  %v2234_v14 = vld [vmem:[#allocation2 + $0x8] sm:$0xff] }
  0x1a   :  { %258 = vmatpush.bf16.msra.mxu0 %v2239_v4  ;;  %v2242_v15 = vld [vmem:[#allocation2 + $0x48] sm:$0xff]  ;;  %v2233_v16 = vld [vmem:[#allocation2] sm:$0xff]  ;;  %v2311_v19 = vld [vmem:[#allocation5 + $0x1ec] sm:$0xf0] }
  0x1b   :  { %271 = vmatpush.bf16.msra.mxu1 %v2247_v5  ;;  %v2241_v17 = vld [vmem:[#allocation2 + $0x40] sm:$0xff]  ;;  %v2307_v22 = vld [vmem:[#allocation5 + $0x1cc] sm:$0xf0]  ;;  %v1763_v27 = vld [vmem:[#allocation5 + $0xf0] sm:$0xf0]  ;;  %v115_v5 = vlaneseq }
  0x1c   :  { %v1889_v18 = vld [vmem:[#allocation5 + $0x1e0] sm:$0xf]  ;;  %v2279_v24 = vld [vmem:[#allocation5 + $0xec] sm:$0xf0]  ;;  %v2277_v26 = vld [vmem:[#allocation5 + $0xe4] sm:$0xf] }
  0x1d   :  { %v1873_v20 = vld [vmem:[#allocation5 + $0x1c0] sm:$0xf]  ;;  %v1890_v21 = vor.u32 %v2311_v19, %v1889_v18  ;;  %v1766_v30 = vor.u32 %v2277_v26, %v1763_v27  ;;  %v2303_v31 = vld [vmem:[#allocation5 + $0x1ac] sm:$0xf0]  ;;  %v2309_v32 = vld [vmem:[#allocation5 + $0x1e4] sm:$0xf] }
  0x1e   :  { %259 = vmatpush.bf16.msra.mxu0 %v2238_v6  ;;  %v1761_v23 = vld [vmem:[#allocation5 + $0xe0] sm:$0xf]  ;;  %v1874_v29 = vor.u32 %v2307_v22, %v1873_v20  ;;  %v1891_v33 = vld [vmem:[#allocation5 + $0x1f0] sm:$0xf0]  ;;  %v2275_v36 = vld [vmem:[#allocation5 + $0xcc] sm:$0xf0] }
  0x1f   :  { %272 = vmatpush.bf16.msra.mxu1 %v2246_v7  ;;  %v1762_v25 = vor.u32 %v2279_v24, %v1761_v23  ;;  %v1857_v28 = vld [vmem:[#allocation5 + $0x1a0] sm:$0xf]  ;;  %694 = vmatpush.bf16.msra.mxu3 %v1890_v21  ;;  %v1894_v34 = vor.u32 %v2309_v32, %v1891_v33  ;;  %v2273_v37 = vld [vmem:[#allocation5 + $0xc4] sm:$0xf]  ;;  %v1747_v39 = vld [vmem:[#allocation5 + $0xd0] sm:$0xf0] }
  0x20   :  { %v1745_v35 = vld [vmem:[#allocation5 + $0xc0] sm:$0xf]  ;;  %v1750_v40 = vor.u32 %v2273_v37, %v1747_v39  ;;  %v2305_v41 = vld [vmem:[#allocation5 + $0x1c4] sm:$0xf]  ;;  %v1875_v42 = vld [vmem:[#allocation5 + $0x1d0] sm:$0xf0]  ;;  %v1858_v44 = vor.u32 %v2303_v31, %v1857_v28 }
  0x21   :  { %681 = vmatpush.bf16.msra.mxu2 %v1762_v25  ;;  %v1746_v38 = vor.u32 %v2275_v36, %v1745_v35  ;;  %v1729_v43 = vld [vmem:[#allocation5 + $0xa0] sm:$0xf]  ;;  %v1878_v45 = vor.u32 %v2305_v41, %v1875_v42  ;;  %v2271_v46 = vld [vmem:[#allocation5 + $0xac] sm:$0xf0]  ;;  %v2269_v47 = vld [vmem:[#allocation5 + $0xa4] sm:$0xf] }
  0x22   :  { %260 = vmatpush.bf16.msra.mxu0 %v2237_v8  ;;  %v1731_v48 = vld [vmem:[#allocation5 + $0xb0] sm:$0xf0]  ;;  %v1841_v49 = vld [vmem:[#allocation5 + $0x180] sm:$0xf]  ;;  %v2299_v50 = vld [vmem:[#allocation5 + $0x18c] sm:$0xf0]  ;;  %v1730_v51 = vor.u32 %v2271_v46, %v1729_v43 }
  0x23   :  { %273 = vmatpush.bf16.msra.mxu1 %v2245_v9  ;;  %695 = vmatpush.bf16.msra.mxu3 %v1874_v29  ;;  %v2301_v52 = vld [vmem:[#allocation5 + $0x1a4] sm:$0xf]  ;;  %v1734_v53 = vor.u32 %v2269_v47, %v1731_v48  ;;  %v1859_v54 = vld [vmem:[#allocation5 + $0x1b0] sm:$0xf0]  ;;  %v1713_v55 = vld [vmem:[#allocation5 + $0x80] sm:$0xf]  ;;  %v1842_v60 = vor.u32 %v2299_v50, %v1841_v49 }
  0x24   :  { %v2267_v56 = vld [vmem:[#allocation5 + $0x8c] sm:$0xf0]  ;;  %v1862_v57 = vor.u32 %v2301_v52, %v1859_v54  ;;  %v2265_v58 = vld [vmem:[#allocation5 + $0x84] sm:$0xf]  ;;  %v1715_v59 = vld [vmem:[#allocation5 + $0x90] sm:$0xf0] }
  0x25   :  { %682 = vmatpush.bf16.msra.mxu2 %v1746_v38  ;;  %v2297_v61 = vld [vmem:[#allocation5 + $0x184] sm:$0xf]  ;;  %v1843_v62 = vld [vmem:[#allocation5 + $0x190] sm:$0xf0]  ;;  %v1825_v63 = vld [vmem:[#allocation5 + $0x160] sm:$0xf]  ;;  %v1714_v1 = vor.u32 %v2267_v56, %v1713_v55  ;;  %v1718_v2 = vor.u32 %v2265_v58, %v1715_v59 }
  0x26   :  { %261 = vmatpush.bf16.msra.mxu0 %v2236_v10  ;;  %v2295_v0 = vld [vmem:[#allocation5 + $0x16c] sm:$0xf0]  ;;  %v1697_v3 = vld [vmem:[#allocation5 + $0x60] sm:$0xf]  ;;  %v1846_v6 = vor.u32 %v2297_v61, %v1843_v62  ;;  %v2261_v7 = vld [vmem:[#allocation5 + $0x64] sm:$0xf] }
  0x27   :  { %274 = vmatpush.bf16.msra.mxu1 %v2244_v11  ;;  %696 = vmatpush.bf16.msra.mxu3 %v1858_v44  ;;  %v2263_v4 = vld [vmem:[#allocation5 + $0x6c] sm:$0xf0]  ;;  %v1699_v8 = vld [vmem:[#allocation5 + $0x70] sm:$0xf0]  ;;  %v1826_v9 = vor.u32 %v2295_v0, %v1825_v63  ;;  %v2293_v10 = vld [vmem:[#allocation5 + $0x164] sm:$0xf] }
  0x28   :  { %v1827_v11 = vld [vmem:[#allocation5 + $0x170] sm:$0xf0]  ;;  %v116_v18 = vand.u32 127, %v115_v5  ;;  %v2257_v20 = vld [vmem:[#allocation5 + $0x44] sm:$0xf] }
  0x29   :  { %683 = vmatpush.bf16.msra.mxu2 %v1730_v51  ;;  %v1830_v19 = vor.u32 %v2293_v10, %v1827_v11  ;;  %v1683_v21 = vld [vmem:[#allocation5 + $0x50] sm:$0xf0]  ;;  %v2289_v23 = vld [vmem:[#allocation5 + $0x144] sm:$0xf]  ;;  %v1793_v25 = vld [vmem:[#allocation5 + $0x120] sm:$0xf] }
  0x2a   :  { %262 = vmatpush.bf16.msra.mxu0 %v2235_v12  ;;  %v1809_v12 = vld [vmem:[#allocation5 + $0x140] sm:$0xf]  ;;  %v1811_v24 = vld [vmem:[#allocation5 + $0x150] sm:$0xf0]  ;;  %v2287_v26 = vld [vmem:[#allocation5 + $0x12c] sm:$0xf0]  ;;  %v1686_v28 = vor.u32 %v2257_v20, %v1683_v21 }
  0x2b   :  { %275 = vmatpush.bf16.msra.mxu1 %v2243_v13  ;;  %697 = vmatpush.bf16.msra.mxu3 %v1842_v60  ;;  %v2291_v13 = vld [vmem:[#allocation5 + $0x14c] sm:$0xf0]  ;;  %v1665_v29 = vld [vmem:[#allocation5 + $0x20] sm:$0xf]  ;;  %v117_v31 = vadd.s32 128, %v116_v18  ;;  %v1814_v32 = vor.u32 %v2289_v23, %v1811_v24  ;;  %v1794_v35 = vor.u32 %v2287_v26, %v1793_v25 }
  0x2c   :  { %v1810_v22 = vor.u32 %v2291_v13, %v1809_v12  ;;  %v2253_v33 = vld [vmem:[#allocation5 + $0x24] sm:$0xf]  ;;  %v1795_v37 = vld [vmem:[#allocation5 + $0x130] sm:$0xf0]  ;;  %v1777_v38 = vld [vmem:[#allocation5 + $0x100] sm:$0xf] }
  0x2d   :  { %684 = vmatpush.bf16.msra.mxu2 %v1714_v1  ;;  %v2285_v36 = vld [vmem:[#allocation5 + $0x124] sm:$0xf]  ;;  %v2283_v39 = vld [vmem:[#allocation5 + $0x10c] sm:$0xf0]  ;;  %v2312_v42 = vld [vmem:[#allocation5 + $0x1f4] sm:$0xf0] }
  0x2e   :  { %263 = vmatpush.bf16.msra.mxu0 %v2234_v14  ;;  %v1698_v14 = vor.u32 %v2263_v4, %v1697_v3  ;;  %v1649_v44 = vld [vmem:[#allocation5] sm:$0xf]  ;;  %v1798_v46 = vor.u32 %v2285_v36, %v1795_v37  ;;  %v2249_v47 = vld [vmem:[#allocation5 + $0x4] sm:$0xf]  ;;  %v1651_v48 = vld [vmem:[#allocation5 + $0x10] sm:$0xf0]  ;;  %v1778_v50 = vor.u32 %v2283_v39, %v1777_v38 }
  0x2f   :  { %276 = vmatpush.bf16.msra.mxu1 %v2242_v15  ;;  %v1702_v15 = vor.u32 %v2261_v7, %v1699_v8  ;;  %698 = vmatpush.bf16.msra.mxu3 %v1826_v9  ;;  %v1769_v49 = vld [vmem:[#allocation5 + $0xe8] sm:$0xf]  ;;  %v2280_v52 = vld [vmem:[#allocation5 + $0xf4] sm:$0xf0]  ;;  %v1771_v54 = vld [vmem:[#allocation5 + $0xf8] sm:$0xf0]  ;;  %v1654_v61 = vor.u32 %v2249_v47, %v1651_v48 }
  0x30   :  { %v1881_v51 = vld [vmem:[#allocation5 + $0x1c8] sm:$0xf]  ;;  %v2281_v58 = vld [vmem:[#allocation5 + $0x104] sm:$0xf]  ;;  %v1779_v59 = vld [vmem:[#allocation5 + $0x110] sm:$0xf0]  ;;  %v1770_v1 = vor.u32 %v2280_v52, %v1769_v49 }
  0x31   :  { %685 = vmatpush.bf16.msra.mxu2 %v1698_v14  ;;  %v2310_v62 = vld [vmem:[#allocation5 + $0x1ec] sm:$0xf]  ;;  %v1899_v63 = vld [vmem:[#allocation5 + $0x1f8] sm:$0xf0]  ;;  %v106_v0 = vld [vmem:[%s2804_s8] sm:$0xff] }
  0x32   :  { %264 = vmatpush.bf16.msra.mxu0 %v2233_v16  ;;  %v1681_v16 = vld [vmem:[#allocation5 + $0x40] sm:$0xf]  ;;  %v1753_v3 = vld [vmem:[#allocation5 + $0xc8] sm:$0xf]  ;;  %v2276_v4 = vld [vmem:[#allocation5 + $0xd4] sm:$0xf0]  ;;  %v2663_v9 = vpack.c.bf16 %v106_v0, %v106_v0  ;;  %v1902_v12 = vor.u32 %v2310_v62, %v1899_v63 }
  0x33   :  { %277 = vmatpush.bf16.msra.mxu1 %v2241_v17  ;;  %v2259_v17 = vld [vmem:[#allocation5 + $0x4c] sm:$0xf0]  ;;  %699 = vmatpush.bf16.msra.mxu3 %v1810_v22  ;;  %v2578_v5 = vmov 1.0|1.0   ;;  %v2274_v7 = vld [vmem:[#allocation5 + $0xcc] sm:$0xf] }
  0x34   :  { %v1682_v27 = vor.u32 %v2259_v17, %v1681_v16  ;;  %v1755_v8 = vld [vmem:[#allocation5 + $0xd8] sm:$0xf0]  ;;  %v1865_v11 = vld [vmem:[#allocation5 + $0x1a8] sm:$0xf]  ;;  %v2304_v13 = vld [vmem:[#allocation5 + $0x1b4] sm:$0xf0]  ;;  %v1754_v16 = vor.u32 %v2276_v4, %v1753_v3 }
  0x35   :  { %v2306_v14 = vld [vmem:[#allocation5 + $0x1cc] sm:$0xf]  ;;  %v1758_v17 = vor.u32 %v2274_v7, %v1755_v8  ;;  %v1739_v21 = vld [vmem:[#allocation5 + $0xb8] sm:$0xf0]  ;;  %v1866_v22 = vor.u32 %v2304_v13, %v1865_v11  ;;  %v1849_v24 = vld [vmem:[#allocation5 + $0x188] sm:$0xf] }
  0x36   :  { %707 = vmatpush.bf16.msrb.mxu0 %v1766_v30  ;;  %v2255_v30 = vld [vmem:[#allocation5 + $0x2c] sm:$0xf0]  ;;  %686 = vmatpush.bf16.msra.mxu2 %v1682_v27  ;;  %v2270_v20 = vld [vmem:[#allocation5 + $0xac] sm:$0xf]  ;;  %v2300_v25 = vld [vmem:[#allocation5 + $0x194] sm:$0xf0] }
  0x37   :  { %720 = vmatpush.bf16.msrb.mxu1 %v1894_v34  ;;  %v1667_v34 = vld [vmem:[#allocation5 + $0x30] sm:$0xf0]  ;;  %v1666_v41 = vor.u32 %v2255_v30, %v1665_v29  ;;  %700 = vmatpush.bf16.msra.mxu3 %v1794_v35  ;;  %v1742_v27 = vor.u32 %v2270_v20, %v1739_v21  ;;  %v1833_v29 = vld [vmem:[#allocation5 + $0x168] sm:$0xf]  ;;  %v2296_v30 = vld [vmem:[#allocation5 + $0x174] sm:$0xf0] }
  0x38   :  { %v1670_v43 = vor.u32 %v2253_v33, %v1667_v34  ;;  %v1867_v33 = vld [vmem:[#allocation5 + $0x1b8] sm:$0xf0]  ;;  %v1721_v35 = vld [vmem:[#allocation5 + $0x88] sm:$0xf]  ;;  %v2268_v36 = vld [vmem:[#allocation5 + $0x94] sm:$0xf0] }
  0x39   :  { %v2266_v37 = vld [vmem:[#allocation5 + $0x8c] sm:$0xf]  ;;  %v1722_v38 = vor.u32 %v2268_v36, %v1721_v35  ;;  %v1723_v39 = vld [vmem:[#allocation5 + $0x98] sm:$0xf0]  ;;  %v1705_v47 = vld [vmem:[#allocation5 + $0x68] sm:$0xf] }
  0x3a   :  { %708 = vmatpush.bf16.msrb.mxu0 %v1750_v40  ;;  %v1897_v40 = vld [vmem:[#allocation5 + $0x1e8] sm:$0xf]  ;;  %687 = vmatpush.bf16.msra.mxu2 %v1666_v41  ;;  %v2264_v48 = vld [vmem:[#allocation5 + $0x74] sm:$0xf0]  ;;  %v2262_v49 = vld [vmem:[#allocation5 + $0x6c] sm:$0xf] }
  0x3b   :  { %721 = vmatpush.bf16.msrb.mxu1 %v1878_v45  ;;  %v2251_v45 = vld [vmem:[#allocation5 + $0xc] sm:$0xf0]  ;;  %v1898_v56 = vor.u32 %v2312_v42, %v1897_v40  ;;  %701 = vmatpush.bf16.msra.mxu3 %v1778_v50  ;;  %v1726_v40 = vor.u32 %v2266_v37, %v1723_v39  ;;  %v1817_v41 = vld [vmem:[#allocation5 + $0x148] sm:$0xf]  ;;  %v2292_v42 = vld [vmem:[#allocation5 + $0x154] sm:$0xf0]  ;;  %v1706_v50 = vor.u32 %v2264_v48, %v1705_v47 }
  0x3c   :  { %v1650_v60 = vor.u32 %v2251_v45, %v1649_v44  ;;  %v1818_v44 = vor.u32 %v2292_v42, %v1817_v41  ;;  %v1851_v45 = vld [vmem:[#allocation5 + $0x198] sm:$0xf0]  ;;  %v1785_v0 = vld [vmem:[#allocation5 + $0x108] sm:$0xf]  ;;  %v2290_v4 = vld [vmem:[#allocation5 + $0x14c] sm:$0xf] }
  0x3d   :  { %v1691_v63 = vld [vmem:[#allocation5 + $0x58] sm:$0xf0]  ;;  %v2256_v8 = vld [vmem:[#allocation5 + $0x34] sm:$0xf0]  ;;  %v2150_v35 = vld [vmem:[#allocation7 + $0x1e0] sm:$0xf] }
  0x3e   :  { %709 = vmatpush.bf16.msrb.mxu0 %v1734_v53  ;;  %v2278_v53 = vld [vmem:[#allocation5 + $0xec] sm:$0xf]  ;;  %688 = vmatpush.bf16.msra.mxu2 %v1650_v60  ;;  %v2260_v60 = vld [vmem:[#allocation5 + $0x54] sm:$0xf0]  ;;  %v1675_v11 = vld [vmem:[#allocation5 + $0x38] sm:$0xf0] }
  0x3f   :  { %722 = vmatpush.bf16.msrb.mxu1 %v1862_v57  ;;  %v2308_v57 = vld [vmem:[#allocation5 + $0x1d4] sm:$0xf0]  ;;  %746 = vmatpush.bf16.msrb.mxu3 %v1898_v56  ;;  %v2375_v36 = vld [vmem:[#allocation7 + $0x1ec] sm:$0xf0]  ;;  %v2022_v41 = vld [vmem:[#allocation7 + $0xe0] sm:$0xf] }
  0x40   :  { %v1882_v10 = vor.u32 %v2308_v57, %v1881_v51  ;;  %702 = vmatmul.bf16.vlgmr.msra.gmra.mxu3 %v2663_v9  ;;  %v1707_v51 = vld [vmem:[#allocation5 + $0x78] sm:$0xf0]  ;;  %v2151_v37 = vor.u32 %v2375_v36, %v2150_v35  ;;  %v2371_v39 = vld [vmem:[#allocation7 + $0x1cc] sm:$0xf0]  ;;  %v2118_v47 = vld [vmem:[#allocation7 + $0x1a0] sm:$0xf] }
  0x41   :  { %v1710_v52 = vor.u32 %v2262_v49, %v1707_v51  ;;  %v1835_v57 = vld [vmem:[#allocation5 + $0x178] sm:$0xf0]  ;;  %v2343_v42 = vld [vmem:[#allocation7 + $0xec] sm:$0xf0]  ;;  %v2373_v49 = vld [vmem:[#allocation7 + $0x1e4] sm:$0xf] }
  0x42   :  { %710 = vmatpush.bf16.msrb.mxu0 %v1718_v2  ;;  %v1774_v2 = vor.u32 %v2278_v53, %v1771_v54  ;;  %733 = vmatpush.bf16.msrb.mxu2 %v1770_v1  ;;  %v1801_v53 = vld [vmem:[#allocation5 + $0x128] sm:$0xf]  ;;  %v2288_v54 = vld [vmem:[#allocation5 + $0x134] sm:$0xf0]  ;;  %v2367_v48 = vld [vmem:[#allocation7 + $0x1ac] sm:$0xf0] }
  0x43   :  { %723 = vmatpush.bf16.msrb.mxu1 %v1846_v6  ;;  %v1782_v6 = vor.u32 %v2281_v58, %v1779_v59  ;;  %747 = vmatpush.bf16.msrb.mxu3 %v1882_v10  ;;  %v1802_v56 = vor.u32 %v2288_v54, %v1801_v53  ;;  %v1689_v59 = vld [vmem:[#allocation5 + $0x48] sm:$0xf]  ;;  %v2284_v1 = vld [vmem:[#allocation5 + $0x114] sm:$0xf0]  ;;  %v2254_v10 = vld [vmem:[#allocation5 + $0x2c] sm:$0xf] }
  0x44   :  { %v1690_v62 = vor.u32 %v2260_v60, %v1689_v59  ;;  %v1786_v3 = vor.u32 %v2284_v1, %v1785_v0  ;;  %v1678_v13 = vor.u32 %v2254_v10, %v1675_v11  ;;  %v2152_v51 = vld [vmem:[#allocation7 + $0x1f0] sm:$0xf0]  ;;  %v2006_v54 = vld [vmem:[#allocation7 + $0xc0] sm:$0xf]  ;;  %v2359_v11 = vld [vmem:[#allocation7 + $0x16c] sm:$0xf0] }
  0x45   :  { %v2155_v53 = vor.u32 %v2373_v49, %v2152_v51  ;;  %v2102_v60 = vld [vmem:[#allocation7 + $0x180] sm:$0xf]  ;;  %v2136_v1 = vld [vmem:[#allocation7 + $0x1d0] sm:$0xf0]  ;;  %v2325_v35 = vld [vmem:[#allocation7 + $0x64] sm:$0xf] }
  0x46   :  { %711 = vmatpush.bf16.msrb.mxu0 %v1702_v15  ;;  %v1883_v15 = vld [vmem:[#allocation5 + $0x1d8] sm:$0xf0]  ;;  %734 = vmatpush.bf16.msrb.mxu2 %v1754_v16  ;;  %v1657_v16 = vld [vmem:[#allocation5 + $0x8] sm:$0xf]  ;;  %v2086_v10 = vld [vmem:[#allocation7 + $0x160] sm:$0xf] }
  0x47   :  { %724 = vmatpush.bf16.msrb.mxu1 %v1830_v19  ;;  %v2272_v19 = vld [vmem:[#allocation5 + $0xb4] sm:$0xf0]  ;;  %v1886_v23 = vor.u32 %v2306_v14, %v1883_v15  ;;  %748 = vmatpush.bf16.msrb.mxu3 %v1866_v22  ;;  %v2286_v14 = vld [vmem:[#allocation5 + $0x12c] sm:$0xf]  ;;  %v1803_v15 = vld [vmem:[#allocation5 + $0x138] sm:$0xf0] }
  0x48   :  { %v1806_v20 = vor.u32 %v2286_v14, %v1803_v15  ;;  %v2282_v22 = vld [vmem:[#allocation5 + $0x10c] sm:$0xf]  ;;  %v2120_v14 = vld [vmem:[#allocation7 + $0x1b0] sm:$0xf0] }
  0x4a   :  { %712 = vmatpush.bf16.msrb.mxu0 %v1686_v28  ;;  %v1850_v28 = vor.u32 %v2300_v25, %v1849_v24 }
  0x4b   :  { %725 = vmatpush.bf16.msrb.mxu1 %v1814_v32  ;;  %v1834_v32 = vor.u32 %v2296_v30, %v1833_v29 }
  0x4c   :  { %749 = vmatpush.bf16.msrb.mxu3 %v1850_v28 }
  0x4e   :  { %713 = vmatpush.bf16.msrb.mxu0 %v1670_v43  ;;  %v2298_v43 = vld [vmem:[#allocation5 + $0x18c] sm:$0xf] }
  0x4f   :  { %726 = vmatpush.bf16.msrb.mxu1 %v1798_v46  ;;  %v1854_v46 = vor.u32 %v2298_v43, %v1851_v45  ;;  %v2341_v43 = vld [vmem:[#allocation7 + $0xe4] sm:$0xf]  ;;  %v2024_v45 = vld [vmem:[#allocation7 + $0xf0] sm:$0xf0] }
  0x50   :  { %750 = vmatpush.bf16.msrb.mxu3 %v1834_v32 }
  0x52   :  { %714 = vmatpush.bf16.msrb.mxu0 %v1654_v61  ;;  %v2258_v61 = vld [vmem:[#allocation5 + $0x4c] sm:$0xf] }
  0x53   :  { %727 = vmatpush.bf16.msrb.mxu1 %v1782_v6  ;;  %v1673_v6 = vld [vmem:[#allocation5 + $0x28] sm:$0xf] }
  0x54   :  { %751 = vmatpush.bf16.msrb.mxu3 %v1818_v44  ;;  %v2023_v44 = vor.u32 %v2343_v42, %v2022_v41  ;;  %v2357_v41 = vld [vmem:[#allocation7 + $0x164] sm:$0xf] }
  0x58   :  { %752 = vmatpush.bf16.msrb.mxu3 %v1802_v56  ;;  %v2337_v56 = vld [vmem:[#allocation7 + $0xc4] sm:$0xf] }
  0x5c   :  { %753 = vmatpush.bf16.msrb.mxu3 %v1786_v3  ;;  %v1990_v3 = vld [vmem:[#allocation7 + $0xa0] sm:$0xf] }
  0x5f   :  { %754 = vmatmul.bf16.vlgmr.msrb.gmra.mxu3 %v2663_v9 }
  0x60   :  { %1263 = vmatpush.bf16.msra.mxu3 %v2151_v37 }
  0x89   :  { %v120_v55 = vpop.permute.xlu0 %119 }
  0x8a   :  { %vm121_vm0 = vcmp.eq.s32.totalorder %v116_v18, %v120_v55  ;;  %vm122_vm1 = vcmp.eq.s32.totalorder %v117_v31, %v120_v55  ;;  %v1737_v18 = vld [vmem:[#allocation5 + $0xa8] sm:$0xf]  ;;  %v2302_v31 = vld [vmem:[#allocation5 + $0x1ac] sm:$0xf] }
  0x8b   :  { %vm1643_vm2 = vmpackc.low %vm121_vm0, %vm121_vm0  ;;  %v1738_v26 = vor.u32 %v2272_v19, %v1737_v18  ;;  %v1870_v34 = vor.u32 %v2302_v31, %v1867_v33  ;;  %v2294_v55 = vld [vmem:[#allocation5 + $0x16c] sm:$0xf]  ;;  %v1659_v19 = vld [vmem:[#allocation5 + $0x18] sm:$0xf0] }
  0x8c   :  { %vm1645_vm3 = vmpackc.low %vm122_vm1, %vm122_vm1  ;;  %1644 = vmatmul.msk.bf16.vlgmr.msra.gmra.mxu0 %vm1643_vm2, %v2578_v5  ;;  %v1838_v58 = vor.u32 %v2294_v55, %v1835_v57  ;;  %v2250_v18 = vld [vmem:[#allocation5 + $0xc] sm:$0xf]  ;;  %v2339_v55 = vld [vmem:[#allocation7 + $0xcc] sm:$0xf0] }
  0x8d   :  { %1646 = vmatmul.msk.bf16.vlgmr.msra.gmra.mxu1 %vm1645_vm3, %v2578_v5  ;;  %759 = vmatpush.bf16.msra.mxu0 %v1774_v2  ;;  %v1694_v2 = vor.u32 %v2258_v61, %v1691_v63  ;;  %v1819_v5 = vld [vmem:[#allocation5 + $0x158] sm:$0xf0]  ;;  %v1662_v24 = vor.u32 %v2250_v18, %v1659_v19  ;;  %v2007_v57 = vor.u32 %v2339_v55, %v2006_v54  ;;  %v2363_v61 = vld [vmem:[#allocation7 + $0x18c] sm:$0xf0]  ;;  %v2329_v19 = vld [vmem:[#allocation7 + $0x84] sm:$0xf] }
  0x8e   :  { %772 = vmatpush.bf16.msra.mxu1 %v1902_v12  ;;  %735 = vmatpush.bf16.msrb.mxu2 %v1738_v26  ;;  %v1822_v7 = vor.u32 %v2290_v4, %v1819_v5  ;;  %v1674_v12 = vor.u32 %v2256_v8, %v1673_v6  ;;  %v2103_v0 = vor.u32 %v2363_v61, %v2102_v60  ;;  %v2335_v4 = vld [vmem:[#allocation7 + $0xac] sm:$0xf0]  ;;  %v2333_v5 = vld [vmem:[#allocation7 + $0xa4] sm:$0xf]  ;;  %v2038_v55 = vld [vmem:[#allocation7 + $0x100] sm:$0xf] }
  0x8f   :  { %v1991_v6 = vor.u32 %v2335_v4, %v1990_v3  ;;  %v2331_v18 = vld [vmem:[#allocation7 + $0x8c] sm:$0xf0]  ;;  %v2072_v60 = vld [vmem:[#allocation7 + $0x150] sm:$0xf0]  ;;  %v2158_v61 = vld [vmem:[#allocation7 + $0x1e8] sm:$0xf] }
  0x90   :  { %v2319_v3 = vld [vmem:[#allocation7 + $0x2c] sm:$0xf0]  ;;  %v2317_v4 = vld [vmem:[#allocation7 + $0x24] sm:$0xf] }
  0x91   :  { %760 = vmatpush.bf16.msra.mxu0 %v1758_v17  ;;  %v2252_v17 = vld [vmem:[#allocation5 + $0x14] sm:$0xf0] }
  0x92   :  { %773 = vmatpush.bf16.msra.mxu1 %v1886_v23  ;;  %736 = vmatpush.bf16.msrb.mxu2 %v1722_v38  ;;  %v1658_v21 = vor.u32 %v2252_v17, %v1657_v16  ;;  %v1787_v23 = vld [vmem:[#allocation5 + $0x118] sm:$0xf0]  ;;  %v2134_v38 = vld [vmem:[#allocation7 + $0x1c0] sm:$0xf] }
  0x93   :  { %v1790_v25 = vor.u32 %v2282_v22, %v1787_v23  ;;  %v1974_v17 = vld [vmem:[#allocation7 + $0x80] sm:$0xf]  ;;  %v1976_v22 = vld [vmem:[#allocation7 + $0x90] sm:$0xf0] }
  0x94   :  { %v1979_v23 = vor.u32 %v2329_v19, %v1976_v22  ;;  %v2315_v19 = vld [vmem:[#allocation7 + $0xc] sm:$0xf0] }
  0x95   :  { %761 = vmatpush.bf16.msra.mxu0 %v1742_v27 }
  0x96   :  { %774 = vmatpush.bf16.msra.mxu1 %v1870_v34  ;;  %737 = vmatpush.bf16.msrb.mxu2 %v1706_v50  ;;  %v2119_v50 = vor.u32 %v2367_v48, %v2118_v47  ;;  %v2323_v47 = vld [vmem:[#allocation7 + $0x4c] sm:$0xf0]  ;;  %v2321_v48 = vld [vmem:[#allocation7 + $0x44] sm:$0xf] }
  0x99   :  { %762 = vmatpush.bf16.msra.mxu0 %v1726_v40  ;;  %v2135_v40 = vor.u32 %v2371_v39, %v2134_v38  ;;  %v2054_v39 = vld [vmem:[#allocation7 + $0x120] sm:$0xf] }
  0x9a   :  { %775 = vmatpush.bf16.msra.mxu1 %v1854_v46  ;;  %738 = vmatpush.bf16.msrb.mxu2 %v1690_v62  ;;  %v2027_v46 = vor.u32 %v2341_v43, %v2024_v45  ;;  %v2369_v62 = vld [vmem:[#allocation7 + $0x1c4] sm:$0xf]  ;;  %v2088_v43 = vld [vmem:[#allocation7 + $0x170] sm:$0xf0] }
  0x9b   :  { %1264 = vmatpush.bf16.msra.mxu3 %v2135_v40  ;;  %v2351_v40 = vld [vmem:[#allocation7 + $0x12c] sm:$0xf0]  ;;  %v2091_v45 = vor.u32 %v2357_v41, %v2088_v43  ;;  %v2014_v43 = vld [vmem:[#allocation7 + $0xc8] sm:$0xf] }
  0x9c   :  { %v2055_v42 = vor.u32 %v2351_v40, %v2054_v39  ;;  %v2160_v39 = vld [vmem:[#allocation7 + $0x1f8] sm:$0xf0] }
  0x9d   :  { %728 = vmatmul.bf16.vlgmr.msrb.gmra.mxu1 %v2663_v9  ;;  %763 = vmatpush.bf16.msra.mxu0 %v1710_v52 }
  0x9e   :  { %776 = vmatpush.bf16.msra.mxu1 %v1838_v58  ;;  %739 = vmatpush.bf16.msrb.mxu2 %v1674_v12  ;;  %v2008_v58 = vld [vmem:[#allocation7 + $0xd0] sm:$0xf0]  ;;  %v2365_v12 = vld [vmem:[#allocation7 + $0x1a4] sm:$0xf] }
  0x9f   :  { %1265 = vmatpush.bf16.msra.mxu3 %v2119_v50  ;;  %v2011_v59 = vor.u32 %v2337_v56, %v2008_v58  ;;  %v2123_v16 = vor.u32 %v2365_v12, %v2120_v14  ;;  %v2347_v56 = vld [vmem:[#allocation7 + $0x10c] sm:$0xf0]  ;;  %v2142_v14 = vld [vmem:[#allocation7 + $0x1c8] sm:$0xf] }
  0xa1   :  { %764 = vmatpush.bf16.msra.mxu0 %v1694_v2  ;;  %v2139_v2 = vor.u32 %v2369_v62, %v2136_v1  ;;  %v2376_v62 = vld [vmem:[#allocation7 + $0x1f4] sm:$0xf0] }
  0xa2   :  { %777 = vmatpush.bf16.msra.mxu1 %v1822_v7  ;;  %740 = vmatpush.bf16.msrb.mxu2 %v1658_v21  ;;  %v1992_v7 = vld [vmem:[#allocation7 + $0xb0] sm:$0xf0]  ;;  %v1975_v21 = vor.u32 %v2331_v18, %v1974_v17  ;;  %v2159_v1 = vor.u32 %v2376_v62, %v2158_v61  ;;  %v1910_v18 = vld [vmem:[#allocation7] sm:$0xf]  ;;  %v2336_v61 = vld [vmem:[#allocation7 + $0xb4] sm:$0xf0] }
  0xa3   :  { %1266 = vmatpush.bf16.msra.mxu3 %v2103_v0  ;;  %v1995_v8 = vor.u32 %v2333_v5, %v1992_v7  ;;  %v1928_v7 = vld [vmem:[#allocation7 + $0x30] sm:$0xf0]  ;;  %v2334_v62 = vld [vmem:[#allocation7 + $0xac] sm:$0xf] }
  0xa5   :  { %765 = vmatpush.bf16.msra.mxu0 %v1678_v13  ;;  %v2087_v13 = vor.u32 %v2359_v11, %v2086_v10  ;;  %v1931_v10 = vor.u32 %v2317_v4, %v1928_v7  ;;  %v2056_v11 = vld [vmem:[#allocation7 + $0x130] sm:$0xf0]  ;;  %v2000_v4 = vld [vmem:[#allocation7 + $0xb8] sm:$0xf0] }
  0xa6   :  { %778 = vmatpush.bf16.msra.mxu1 %v1806_v20  ;;  %v2680_v20 = vld [vmem:[%s2799_s3] sm:$0xf]  ;;  %v2003_v7 = vor.u32 %v2334_v62, %v2000_v4  ;;  %v2046_v62 = vld [vmem:[#allocation7 + $0x108] sm:$0xf] }
  0xa7   :  { %1267 = vmatpush.bf16.msra.mxu3 %v2087_v13  ;;  %v354_v36 = vperm.slane %v2680_v20, 1  ;;  %v353_v50 = vperm.slane %v2680_v20, 0 }
  0xa9   :  { %766 = vmatpush.bf16.msra.mxu0 %v1662_v24  ;;  %v2070_v24 = vld [vmem:[#allocation7 + $0x140] sm:$0xf] }
  0xaa   :  { %779 = vmatpush.bf16.msra.mxu1 %v1790_v25  ;;  %v2355_v25 = vld [vmem:[#allocation7 + $0x14c] sm:$0xf0] }
  0xad   :  { %780 = vmatmul.bf16.vlgmr.msra.gmra.mxu1 %v2663_v9 }
  0xae   :  { %1289 = vmatpush.bf16.msrb.mxu1 %v2155_v53  ;;  %v1944_v53 = vld [vmem:[#allocation7 + $0x50] sm:$0xf0] }
  0xaf   :  { %v1947_v54 = vor.u32 %v2321_v48, %v1944_v53  ;;  %v2364_v53 = vld [vmem:[#allocation7 + $0x194] sm:$0xf0] }
  0xb2   :  { %1290 = vmatpush.bf16.msrb.mxu1 %v2139_v2  ;;  %v1926_v2 = vld [vmem:[#allocation7 + $0x20] sm:$0xf] }
  0xb6   :  { %1291 = vmatpush.bf16.msrb.mxu1 %v2123_v16 }
  0xc3   :  { %v2669_v32 = vpop.f32.mrf.mxu3 }
  0xcb   :  { %v705_v33 = vpop.f32.mrf.mxu3 }
  0xcc   :  { %v2327_v33 = vld [vmem:[#allocation7 + $0x6c] sm:$0xf0] }
  0xe2   :  { %v2673_v52 = vpop.f32.mrf.mxu3 }
  0xea   :  { %v757_v15 = vpop.f32.mrf.mxu3 }
  0xeb   :  { %v2372_v15 = vld [vmem:[#allocation7 + $0x1d4] sm:$0xf0] }
  0xec   :  { %v2143_v17 = vor.u32 %v2372_v15, %v2142_v14  ;;  %v2332_v15 = vld [vmem:[#allocation7 + $0x94] sm:$0xf0] }
 0x109   :  { %v266_v26 = vpop.f32.mrf.mxu0 }
 0x10a   :  { %v279_v27 = vpop.f32.mrf.mxu1 }
 0x10b   :  { %v280_v28 = vadd.f32 %v279_v27, %v266_v26  ;;  %v2361_v26 = vld [vmem:[#allocation7 + $0x184] sm:$0xf]  ;;  %v2071_v27 = vor.u32 %v2355_v25, %v2070_v24  ;;  %v1912_v24 = vld [vmem:[#allocation7 + $0x10] sm:$0xf0]  ;;  %v2030_v25 = vld [vmem:[#allocation7 + $0xe8] sm:$0xf] }
 0x10d   :  { %v283_v29 = vpack.c.bf16 %v280_v28, %v280_v28  ;;  %v2104_v28 = vld [vmem:[#allocation7 + $0x190] sm:$0xf0]  ;;  %1268 = vmatpush.bf16.msra.mxu3 %v2071_v27 }
 0x10f   :  { %689 = vmatmul.bf16.vlgmr.msra.gmra.mxu2 %v283_v29  ;;  %715 = vmatmul.bf16.vlgmr.msrb.gmra.mxu0 %v283_v29 }
 0x110   :  { %1250 = vmatpush.bf16.msra.mxu2 %v2023_v44  ;;  %1276 = vmatpush.bf16.msrb.mxu0 %v2027_v46  ;;  %v1942_v46 = vld [vmem:[#allocation7 + $0x40] sm:$0xf] }
 0x111   :  { %v268_v30 = vpop.f32.mrf.mxu0  ;;  %1269 = vmatpush.bf16.msra.mxu3 %v2055_v42  ;;  %v1943_v51 = vor.u32 %v2323_v47, %v1942_v46 }
 0x112   :  { %v281_v31 = vpop.f32.mrf.mxu1  ;;  %v2107_v30 = vor.u32 %v2361_v26, %v2104_v28  ;;  %v2344_v26 = vld [vmem:[#allocation7 + $0xf4] sm:$0xf0] }
 0x113   :  { %v1958_v31 = vld [vmem:[#allocation7 + $0x60] sm:$0xf]  ;;  %v2031_v28 = vor.u32 %v2344_v26, %v2030_v25 }
 0x114   :  { %1251 = vmatpush.bf16.msra.mxu2 %v2007_v57  ;;  %1277 = vmatpush.bf16.msrb.mxu0 %v2011_v59  ;;  %v1959_v37 = vor.u32 %v2327_v33, %v1958_v31  ;;  %v2353_v57 = vld [vmem:[#allocation7 + $0x144] sm:$0xf]  ;;  %v2039_v59 = vor.u32 %v2347_v56, %v2038_v55  ;;  %v2144_v56 = vld [vmem:[#allocation7 + $0x1d8] sm:$0xf0] }
 0x115   :  { %1292 = vmatpush.bf16.msrb.mxu1 %v2107_v30  ;;  %v2075_v0 = vor.u32 %v2353_v57, %v2072_v60  ;;  %v2032_v30 = vld [vmem:[#allocation7 + $0xf8] sm:$0xf0]  ;;  %v2345_v31 = vld [vmem:[#allocation7 + $0x104] sm:$0xf]  ;;  %v107_v57 = vld [vmem:[%s2804_s8 + $0x8] sm:$0xff] }
 0x116   :  { %1270 = vmatpush.bf16.msra.mxu3 %v2039_v59  ;;  %v1998_v60 = vld [vmem:[#allocation7 + $0xa8] sm:$0xf] }
 0x118   :  { %1252 = vmatpush.bf16.msra.mxu2 %v1991_v6  ;;  %1278 = vmatpush.bf16.msrb.mxu0 %v1995_v8  ;;  %v1927_v6 = vor.u32 %v2319_v3, %v1926_v2  ;;  %v355_v2 = vperm.slane %v2680_v20, 2  ;;  %v1999_v3 = vor.u32 %v2336_v61, %v1998_v60  ;;  %v1952_v61 = vld [vmem:[#allocation7 + $0x58] sm:$0xf0] }
 0x119   :  { %1293 = vmatpush.bf16.msrb.mxu1 %v2091_v45  ;;  %v2338_v45 = vld [vmem:[#allocation7 + $0xcc] sm:$0xf] }
 0x11a   :  { %v2671_v34 = vpop.f32.mrf.mxu1  ;;  %1315 = vmatpush.bf16.msrb.mxu3 %v2159_v1  ;;  %v356_v1 = vperm.slane %v2680_v20, 3  ;;  %v1982_v20 = vld [vmem:[#allocation7 + $0x88] sm:$0xf] }
 0x11c   :  { %1253 = vmatpush.bf16.msra.mxu2 %v1975_v21  ;;  %1279 = vmatpush.bf16.msrb.mxu0 %v1979_v23  ;;  %v2313_v21 = vld [vmem:[#allocation7 + $0x4] sm:$0xf]  ;;  %v1911_v23 = vor.u32 %v2315_v19, %v1910_v18  ;;  %v1984_v18 = vld [vmem:[#allocation7 + $0x98] sm:$0xf0]  ;;  %v2078_v19 = vld [vmem:[#allocation7 + $0x148] sm:$0xf] }
 0x11d   :  { %1294 = vmatpush.bf16.msrb.mxu1 %v2075_v0  ;;  %v1915_v27 = vor.u32 %v2313_v21, %v1912_v24  ;;  %v2692_v0 = vpack.c.bf16 %v107_v57, %v107_v57 }
 0x11e   :  { %1316 = vmatpush.bf16.msrb.mxu3 %v2143_v17  ;;  %v2330_v17 = vld [vmem:[#allocation7 + $0x8c] sm:$0xf] }
 0x11f   :  { %741 = vmatmul.bf16.vlgmr.msrb.gmra.mxu2 %v283_v29  ;;  %767 = vmatmul.bf16.vlgmr.msra.gmra.mxu0 %v283_v29  ;;  %v1987_v26 = vor.u32 %v2330_v17, %v1984_v18  ;;  %v2350_v17 = vld [vmem:[#allocation7 + $0x12c] sm:$0xf] }
 0x120   :  { %1254 = vmatpush.bf16.msra.mxu2 %v1959_v37  ;;  %v2126_v37 = vld [vmem:[#allocation7 + $0x1a8] sm:$0xf]  ;;  %1271 = vmatmul.bf16.vlgmr.msra.gmra.mxu3 %v2692_v0 }
 0x122   :  { %v731_v9 = vpop.f32.mrf.mxu1 }
 0x123   :  { %v1960_v9 = vld [vmem:[#allocation7 + $0x70] sm:$0xf0] }
 0x124   :  { %v1963_v38 = vor.u32 %v2325_v35, %v1960_v9  ;;  %1255 = vmatpush.bf16.msra.mxu2 %v1943_v51  ;;  %v2110_v51 = vld [vmem:[#allocation7 + $0x188] sm:$0xf] }
 0x126   :  { %1280 = vmatpush.bf16.msrb.mxu0 %v1963_v38  ;;  %v2374_v38 = vld [vmem:[#allocation7 + $0x1ec] sm:$0xf] }
 0x127   :  { %v2163_v42 = vor.u32 %v2374_v38, %v2160_v39  ;;  %v2328_v38 = vld [vmem:[#allocation7 + $0x74] sm:$0xf0]  ;;  %v2326_v39 = vld [vmem:[#allocation7 + $0x6c] sm:$0xf] }
 0x128   :  { %1256 = vmatpush.bf16.msra.mxu2 %v1927_v6 }
 0x12a   :  { %v2675_v63 = vpop.f32.mrf.mxu1  ;;  %1281 = vmatpush.bf16.msrb.mxu0 %v1947_v54  ;;  %v2370_v54 = vld [vmem:[#allocation7 + $0x1cc] sm:$0xf] }
 0x12b   :  { %v2147_v59 = vor.u32 %v2370_v54, %v2144_v56  ;;  %v1950_v54 = vld [vmem:[#allocation7 + $0x48] sm:$0xf]  ;;  %v2322_v56 = vld [vmem:[#allocation7 + $0x4c] sm:$0xf] }
 0x12c   :  { %1257 = vmatpush.bf16.msra.mxu2 %v1911_v23  ;;  %v2356_v23 = vld [vmem:[#allocation7 + $0x154] sm:$0xf0]  ;;  %v1955_v4 = vor.u32 %v2322_v56, %v1952_v61  ;;  %v2227_v61 = vld [vmem:[#allocation8 + $0x70] sm:$0xf] }
 0x12e   :  { %1282 = vmatpush.bf16.msrb.mxu0 %v1931_v10  ;;  %v2366_v10 = vld [vmem:[#allocation7 + $0x1ac] sm:$0xf] }
 0x130   :  { %1302 = vmatpush.bf16.msrb.mxu2 %v2031_v28  ;;  %v2112_v28 = vld [vmem:[#allocation7 + $0x198] sm:$0xf0] }
 0x132   :  { %v783_v29 = vpop.f32.mrf.mxu1  ;;  %1283 = vmatpush.bf16.msrb.mxu0 %v1915_v27  ;;  %v2362_v27 = vld [vmem:[#allocation7 + $0x18c] sm:$0xf] }
 0x133   :  { %v2342_v29 = vld [vmem:[#allocation7 + $0xec] sm:$0xf] }
 0x134   :  { %v2035_v35 = vor.u32 %v2342_v29, %v2032_v30 }
 0x136   :  { %1328 = vmatpush.bf16.msra.mxu0 %v2035_v35 }
 0x18c   :  { %v716_v44 = vpop.f32.mrf.mxu0 }
 0x18d   :  { %v717_v49 = vadd.f32 %v716_v44, %v354_v36  ;;  %v2040_v36 = vld [vmem:[#allocation7 + $0x110] sm:$0xf0]  ;;  %v2340_v44 = vld [vmem:[#allocation7 + $0xd4] sm:$0xf0] }
 0x18e   :  { %v2043_v9 = vor.u32 %v2345_v31, %v2040_v36  ;;  %v2015_v48 = vor.u32 %v2340_v44, %v2014_v43  ;;  %v2079_v31 = vor.u32 %v2356_v23, %v2078_v19  ;;  %v1968_v43 = vld [vmem:[#allocation7 + $0x78] sm:$0xf0]  ;;  %v2062_v44 = vld [vmem:[#allocation7 + $0x128] sm:$0xf]  ;;  %v2316_v23 = vld [vmem:[#allocation7 + $0x14] sm:$0xf0] }
 0x18f   :  { %v730_v58 = vadd.f32 %v2671_v34, %v717_v49  ;;  %v2349_v34 = vld [vmem:[#allocation7 + $0x124] sm:$0xf]  ;;  %v2016_v49 = vld [vmem:[#allocation7 + $0xd8] sm:$0xf0] }
 0x190   :  { %v2059_v13 = vor.u32 %v2349_v34, %v2056_v11  ;;  %1303 = vmatpush.bf16.msrb.mxu2 %v2015_v48  ;;  %v2128_v34 = vld [vmem:[#allocation7 + $0x1b8] sm:$0xf0]  ;;  %v1971_v48 = vor.u32 %v2326_v39, %v1968_v43 }
 0x191   :  { %v1904_v5 = vmul.f32 -1.442695, %v730_v58  ;;  %v2111_v58 = vor.u32 %v2364_v53, %v2110_v51  ;;  %v2131_v14 = vor.u32 %v2366_v10, %v2128_v34  ;;  %v1934_v10 = vld [vmem:[#allocation7 + $0x28] sm:$0xf]  ;;  %v2320_v34 = vld [vmem:[#allocation7 + $0x34] sm:$0xf0] }
 0x192   :  { %v690_v8 = vpop.f32.mrf.mxu2  ;;  %1295 = vmatpush.bf16.msrb.mxu1 %v2059_v13  ;;  %v2064_v19 = vld [vmem:[#allocation7 + $0x138] sm:$0xf0] }
 0x193   :  { %2407 = vpow2.f32 %v1904_v5  ;;  %v691_v12 = vadd.f32 %v690_v8, %v353_v50  ;;  %v2019_v50 = vor.u32 %v2338_v45, %v2016_v49  ;;  %v2094_v5 = vld [vmem:[#allocation7 + $0x168] sm:$0xf]  ;;  %v2360_v8 = vld [vmem:[#allocation7 + $0x174] sm:$0xf0]  ;;  %v2358_v49 = vld [vmem:[#allocation7 + $0x16c] sm:$0xf] }
 0x194   :  { %v718_v16 = vpop.f32.mrf.mxu0  ;;  %1304 = vmatpush.bf16.msrb.mxu2 %v1999_v3  ;;  %v2095_v13 = vor.u32 %v2360_v8, %v2094_v5  ;;  %v2348_v5 = vld [vmem:[#allocation7 + $0x114] sm:$0xf0]  ;;  %v2080_v8 = vld [vmem:[#allocation7 + $0x158] sm:$0xf0] }
 0x195   :  { %v704_v22 = vadd.f32 %v2669_v32, %v691_v12  ;;  %v2368_v32 = vld [vmem:[#allocation7 + $0x1b4] sm:$0xf0]  ;;  %1329 = vmatpush.bf16.msra.mxu0 %v2019_v50  ;;  %v1983_v16 = vor.u32 %v2332_v15, %v1982_v20  ;;  %v2096_v50 = vld [vmem:[#allocation7 + $0x178] sm:$0xf0]  ;;  %v1935_v20 = vor.u32 %v2320_v34, %v1934_v10  ;;  %v2318_v15 = vld [vmem:[#allocation7 + $0x2c] sm:$0xf] }
 0x196   :  { %v2127_v41 = vor.u32 %v2368_v32, %v2126_v37  ;;  %1296 = vmatpush.bf16.msrb.mxu1 %v2043_v9  ;;  %v1966_v32 = vld [vmem:[#allocation7 + $0x68] sm:$0xf]  ;;  %v2389_v10 = vld [vmem:[#allocation8 + $0x64] sm:$0xf] }
 0x197   :  { %v1903_v33 = vmul.f32 -1.442695, %v704_v22 }
 0x198   :  { %1317 = vmatpush.bf16.msrb.mxu3 %v2127_v41  ;;  %1305 = vmatpush.bf16.msrb.mxu2 %v1983_v16  ;;  %v1936_v16 = vld [vmem:[#allocation7 + $0x38] sm:$0xf0] }
 0x199   :  { %v2408_v40 = vpop.eup %2407  ;;  %2409 = vpow2.f32 %v1903_v33  ;;  %1330 = vmatpush.bf16.msra.mxu0 %v2003_v7  ;;  %1297 = vmatmul.bf16.vlgmr.msrb.gmra.mxu1 %v2692_v0  ;;  %v2115_v33 = vor.u32 %v2362_v27, %v2112_v28  ;;  %v2047_v7 = vor.u32 %v2348_v5, %v2046_v62  ;;  %v1939_v18 = vor.u32 %v2318_v15, %v1936_v16  ;;  %v110_v27 = vld [vmem:[%s2805_s9] sm:$0xff]  ;;  %v2392_v62 = vld [vmem:[#allocation8 + $0x74] sm:$0xf0]  ;;  %v2211_v15 = vld [vmem:[#allocation8 + $0x50] sm:$0xf] }
 0x19a   :  { %v2686_v46 = vadd.f32 1.0, %v2408_v40  ;;  %v692_v47 = vpop.f32.mrf.mxu2  ;;  %1341 = vmatpush.bf16.msra.mxu1 %v2163_v42  ;;  %v1967_v42 = vor.u32 %v2328_v38, %v1966_v32  ;;  %v2388_v16 = vld [vmem:[#allocation8 + $0x54] sm:$0xf0] }
 0x19c   :  { %2411 = vrcp.f32 %v2686_v46  ;;  %v768_v55 = vpop.f32.mrf.mxu0  ;;  %1318 = vmatpush.bf16.msrb.mxu3 %v2111_v58  ;;  %v823_v11 = vand.u32 2147483648, %v2686_v46  ;;  %v821_v37 = vand.u32 2147483647, %v2686_v46  ;;  %vm817_vm5 = vweird.f32 %v2686_v46  ;;  %1306 = vmatpush.bf16.msrb.mxu2 %v1967_v42 }
 0x19d   :  { %v769_v29 = vadd.f32 %v768_v55, %v356_v1  ;;  %1331 = vmatpush.bf16.msra.mxu0 %v1987_v26  ;;  %v2324_v55 = vld [vmem:[#allocation7 + $0x54] sm:$0xf0]  ;;  %v1920_v26 = vld [vmem:[#allocation7 + $0x18] sm:$0xf0]  ;;  %v2391_v1 = vld [vmem:[#allocation8 + $0x74] sm:$0xf] }
 0x19e   :  { %1342 = vmatpush.bf16.msra.mxu1 %v2147_v59  ;;  %v2706_v36 = vor.u32 1.1754944e-38, %v823_v11  ;;  %v2099_v59 = vor.u32 %v2358_v49, %v2096_v50  ;;  %v1951_v60 = vor.u32 %v2324_v55, %v1950_v54  ;;  %vm822_vm9 = vcmp.eq.f32.partialorder %v821_v37, 8.507059e+37 }
 0x19f   :  { %v2410_v6 = vpop.eup %2409  ;;  %v782_v47 = vadd.f32 %v2675_v63, %v769_v29 }
 0x1a0   :  { %v2697_v12 = vadd.f32 1.0, %v2410_v6  ;;  %1319 = vmatpush.bf16.msrb.mxu3 %v2095_v13  ;;  %v2354_v6 = vld [vmem:[#allocation7 + $0x14c] sm:$0xf]  ;;  %1307 = vmatpush.bf16.msrb.mxu2 %v1951_v60 }
 0x1a1   :  { %1332 = vmatpush.bf16.msra.mxu0 %v1971_v48 }
 0x1a2   :  { %v2701_v21 = vpop.eup %2411  ;;  %2413 = vrcp.f32 %v2697_v12  ;;  %v742_v22 = vpop.f32.mrf.mxu2  ;;  %1343 = vmatpush.bf16.msra.mxu1 %v2131_v14  ;;  %v806_v57 = vand.u32 2147483647, %v2697_v12  ;;  %v808_v3 = vand.u32 2147483648, %v2697_v12  ;;  %v2083_v14 = vor.u32 %v2354_v6, %v2080_v8  ;;  %v2390_v8 = vld [vmem:[#allocation8 + $0x64] sm:$0xf0] }
 0x1a3   :  { %v813_v24 = vmul.f32 %v2701_v21, %v2686_v46  ;;  %v743_v25 = vadd.f32 %v742_v22, %v355_v2  ;;  %vm818_vm4 = vweird.f32 %v2701_v21  ;;  %v1918_v22 = vld [vmem:[#allocation7 + $0x8] sm:$0xf]  ;;  %vm802_vm8 = vweird.f32 %v2697_v12 }
 0x1a4   :  { %v770_v30 = vpop.f32.mrf.mxu0  ;;  %1320 = vmatpush.bf16.msrb.mxu3 %v2079_v31  ;;  %vm2724_vm6 = vmor %vm817_vm5, %vm818_vm4  ;;  %v809_v28 = vor.u32 1.1754944e-38, %v808_v3  ;;  %v2067_v31 = vor.u32 %v2350_v17, %v2064_v19  ;;  %vm807_vm11 = vcmp.eq.f32.partialorder %v806_v57, 8.507059e+37  ;;  %1308 = vmatpush.bf16.msrb.mxu2 %v1935_v20  ;;  %v1919_v46 = vor.u32 %v2316_v23, %v1918_v22  ;;  %v2229_v3 = vld [vmem:[#allocation8 + $0x78] sm:$0xf0]  ;;  %v2387_v17 = vld [vmem:[#allocation8 + $0x54] sm:$0xf] }
 0x1a5   :  { %v814_v35 = vsub.f32 1.0, %v813_v24  ;;  %v756_v9 = vadd.f32 %v2673_v52, %v743_v25  ;;  %v2352_v52 = vld [vmem:[#allocation7 + $0x134] sm:$0xf0]  ;;  %1333 = vmatpush.bf16.msra.mxu0 %v1955_v4  ;;  %v2232_v4 = vor.u32 %v2391_v1, %v2229_v3  ;;  %v2212_v22 = vor.u32 %v2388_v16, %v2211_v15  ;;  %v2213_v23 = vld [vmem:[#allocation8 + $0x58] sm:$0xf0] }
 0x1a6   :  { %1344 = vmatpush.bf16.msra.mxu1 %v2115_v33  ;;  %v2063_v63 = vor.u32 %v2352_v52, %v2062_v44  ;;  %v2346_v33 = vld [vmem:[#allocation7 + $0x10c] sm:$0xf] }
 0x1a7   :  { %v815_v40 = vmul.f32 %v2701_v21, %v814_v35  ;;  %v1905_v41 = vmul.f32 -1.442695, %v756_v9  ;;  %v2048_v35 = vld [vmem:[#allocation7 + $0x118] sm:$0xf0]  ;;  %v2173_v3 = vld [vmem:[#allocation8 + $0x8] sm:$0xf0] }
 0x1a8   :  { %v2711_v45 = vpop.eup %2413  ;;  %1321 = vmatpush.bf16.msrb.mxu3 %v2063_v63  ;;  %1309 = vmatpush.bf16.msrb.mxu2 %v1919_v46 }
 0x1a9   :  { %v798_v51 = vmul.f32 %v2711_v45, %v2697_v12  ;;  %v816_v53 = vadd.f32 %v2701_v21, %v815_v40  ;;  %2415 = vpow2.f32 %v1905_v41  ;;  %vm803_vm7 = vweird.f32 %v2711_v45  ;;  %1334 = vmatpush.bf16.msra.mxu0 %v1939_v18 }
 0x1aa   :  { %v744_v58 = vpop.f32.mrf.mxu2  ;;  %2417 = vtanh.f32 %v782_v47  ;;  %1345 = vmatpush.bf16.msra.mxu1 %v2099_v59  ;;  %vm804_vm10 = vmor %vm802_vm8, %vm803_vm7  ;;  %v2760_v59 = vld [vmem:[%s2801_s5] sm:$0xf] }
 0x1ab   :  { %v799_v2 = vsub.f32 1.0, %v798_v51  ;;  %v820_v13 = vsel %vm2724_vm6, %v2701_v21, %v816_v53  ;;  %v2314_v21 = vld [vmem:[#allocation7 + $0xc] sm:$0xf]  ;;  %v923_v6 = vperm.slane %v2760_v59, 1  ;;  %v922_v19 = vperm.slane %v2760_v59, 0 }
 0x1ac   :  { %v825_v29 = vsel %vm822_vm9, %v2706_v36, %v820_v13  ;;  %1322 = vmatpush.bf16.msrb.mxu3 %v2047_v7  ;;  %v1923_v32 = vor.u32 %v2314_v21, %v1920_v26  ;;  %v2051_v36 = vor.u32 %v2346_v33, %v2048_v35  ;;  %v2219_v7 = vld [vmem:[#allocation8 + $0x60] sm:$0xf]  ;;  %v2195_v35 = vld [vmem:[#allocation8 + $0x30] sm:$0xf]  ;;  %v925_v1 = vperm.slane %v2760_v59, 3 }
 0x1ad   :  { %v800_v11 = vmul.f32 %v2711_v45, %v799_v2  ;;  %v843_v38 = vmul.f32 %v825_v29, %v110_v27  ;;  %v2228_v2 = vor.u32 %v2392_v62, %v2227_v61  ;;  %v2220_v34 = vor.u32 %v2390_v8, %v2219_v7  ;;  %v2203_v26 = vld [vmem:[#allocation8 + $0x40] sm:$0xf]  ;;  %v2386_v27 = vld [vmem:[#allocation8 + $0x44] sm:$0xf0] }
 0x1ae   :  { %1346 = vmatpush.bf16.msra.mxu1 %v2083_v14  ;;  %1335 = vmatpush.bf16.msra.mxu0 %v1923_v32 }
 0x1af   :  { %v2416_v24 = vpop.eup %2415  ;;  %v801_v25 = vadd.f32 %v2711_v45, %v800_v11  ;;  %1323 = vmatmul.bf16.vlgmr.msrb.gmra.mxu3 %v2692_v0  ;;  %v2221_v11 = vld [vmem:[#allocation8 + $0x68] sm:$0xf0] }
 0x1b0   :  { %v796_v30 = vadd.f32 1.0, %v2416_v24  ;;  %v2418_v37 = vpop.eup %2417  ;;  %1535 = vmatpush.bf16.msra.mxu3 %v2232_v4  ;;  %v2224_v14 = vor.u32 %v2389_v10, %v2221_v11  ;;  %v2216_v24 = vor.u32 %v2387_v17, %v2213_v23 }
 0x1b1   :  { %v805_v12 = vsel %vm804_vm10, %v2711_v45, %v801_v25 }
 0x1b2   :  { %v810_v9 = vsel %vm807_vm11, %v809_v28, %v805_v12  ;;  %2419 = vrcp.f32 %v796_v30  ;;  %1347 = vmatpush.bf16.msra.mxu1 %v2067_v31  ;;  %v838_v44 = vand.u32 2147483648, %v796_v30  ;;  %v836_v47 = vand.u32 2147483647, %v796_v30  ;;  %v2385_v28 = vld [vmem:[#allocation8 + $0x44] sm:$0xf] }
 0x1b3   :  { %v844_v39 = vmul.f32 %v2418_v37, %v810_v9  ;;  %vm832_vm13 = vweird.f32 %v796_v30  ;;  %v2205_v31 = vld [vmem:[#allocation8 + $0x48] sm:$0xf0]  ;;  %v2384_v37 = vld [vmem:[#allocation8 + $0x34] sm:$0xf0]  ;;  %v2383_v9 = vld [vmem:[#allocation8 + $0x34] sm:$0xf] }
 0x1b4   :  { %v839_v52 = vor.u32 1.1754944e-38, %v838_v44  ;;  %vm837_vm15 = vcmp.eq.f32.partialorder %v836_v47, 8.507059e+37  ;;  %1536 = vmatpush.bf16.msra.mxu3 %v2224_v14  ;;  %v2208_v46 = vor.u32 %v2385_v28, %v2205_v31  ;;  %v2382_v44 = vld [vmem:[#allocation8 + $0x24] sm:$0xf0]  ;;  %v2381_v47 = vld [vmem:[#allocation8 + $0x24] sm:$0xf] }
 0x1b5   :  { %v845_v40 = vadd.f32 %v844_v39, %v843_v38  ;;  %v2196_v38 = vor.u32 %v2384_v37, %v2195_v35  ;;  %v2197_v39 = vld [vmem:[#allocation8 + $0x38] sm:$0xf0] }
 0x1b6   :  { %1348 = vmatpush.bf16.msra.mxu1 %v2051_v36  ;;  %v2200_v36 = vor.u32 %v2383_v9, %v2197_v39 }
 0x1b7   :  { %849 = vst [vmem:[%s2808_s12] sm:$0xff] %v845_v40  ;;  %2421 = vtanh.f32 %v845_v40 }
 0x1b8   :  { %v2420_v41 = vpop.eup %2419  ;;  %1537 = vmatpush.bf16.msra.mxu3 %v2216_v24 }
 0x1b9   :  { %v828_v42 = vmul.f32 %v2420_v41, %v796_v30  ;;  %1349 = vmatmul.bf16.vlgmr.msra.gmra.mxu1 %v2692_v0  ;;  %vm833_vm12 = vweird.f32 %v2420_v41  ;;  %v1272_v0 = vpop.f32.mrf.mxu3  ;;  %v2204_v30 = vor.u32 %v2386_v27, %v2203_v26 }
 0x1ba   :  { %vm834_vm14 = vmor %vm832_vm13, %vm833_vm12 }
 0x1bb   :  { %v829_v43 = vsub.f32 1.0, %v828_v42 }
 0x1bc   :  { %1538 = vmatpush.bf16.msra.mxu3 %v2208_v46 }
 0x1bd   :  { %v830_v45 = vmul.f32 %v2420_v41, %v829_v43  ;;  %v2422_v50 = vpop.eup %2421  ;;  %v2187_v43 = vld [vmem:[#allocation8 + $0x20] sm:$0xf] }
 0x1bf   :  { %v831_v48 = vadd.f32 %v2420_v41, %v830_v45  ;;  %v2188_v45 = vor.u32 %v2382_v44, %v2187_v43 }
 0x1c0   :  { %1539 = vmatpush.bf16.msra.mxu3 %v2200_v36 }
 0x1c1   :  { %v835_v49 = vsel %vm834_vm14, %v2420_v41, %v831_v48  ;;  %v1274_v56 = vpop.f32.mrf.mxu3  ;;  %v2189_v48 = vld [vmem:[#allocation8 + $0x28] sm:$0xf0] }
 0x1c2   :  { %v840_v51 = vsel %vm837_vm15, %v839_v52, %v835_v49  ;;  %v2179_v52 = vld [vmem:[#allocation8 + $0x10] sm:$0xf]  ;;  %v2378_v56 = vld [vmem:[#allocation8 + $0x4] sm:$0xf0] }
 0x1c3   :  { %v847_v53 = vmul.f32 %v2422_v50, %v840_v51  ;;  %v2380_v50 = vld [vmem:[#allocation8 + $0x14] sm:$0xf0]  ;;  %v2192_v51 = vor.u32 %v2381_v47, %v2189_v48 }
 0x1c5   :  { %848 = vst [vmem:[%s2807_s11] sm:$0xff] %v847_v53  ;;  %v850_v54 = vpack.c.bf16 %v847_v53, %v847_v53  ;;  %v2180_v53 = vor.u32 %v2380_v50, %v2179_v52  ;;  %1540 = vmatpush.bf16.msra.mxu3 %v2192_v51  ;;  %v1436_v51 = vld [vmem:[%s2803_s7] sm:$0x3] }
 0x1c7   :  { %1258 = vmatmul.bf16.vlgmr.msra.gmra.mxu2 %v850_v54  ;;  %1284 = vmatmul.bf16.vlgmr.msrb.gmra.mxu0 %v850_v54 }
 0x1c8   :  { %1522 = vmatpush.bf16.msra.mxu2 %v2228_v2  ;;  %v2377_v2 = vld [vmem:[#allocation8 + $0x4] sm:$0xf] }
 0x1c9   :  { %v2176_v10 = vor.u32 %v2377_v2, %v2173_v3 }
 0x1cc   :  { %1523 = vmatpush.bf16.msra.mxu2 %v2220_v34 }
 0x1d0   :  { %1524 = vmatpush.bf16.msra.mxu2 %v2212_v22 }
 0x1d4   :  { %1525 = vmatpush.bf16.msra.mxu2 %v2204_v30  ;;  %v111_v30 = vld [vmem:[%s2805_s9 + $0x8] sm:$0xff] }
 0x1d7   :  { %1310 = vmatmul.bf16.vlgmr.msrb.gmra.mxu2 %v850_v54  ;;  %1336 = vmatmul.bf16.vlgmr.msra.gmra.mxu0 %v850_v54  ;;  %v2379_v54 = vld [vmem:[#allocation8 + $0x14] sm:$0xf] }
 0x1d8   :  { %1526 = vmatpush.bf16.msra.mxu2 %v2196_v38 }
 0x1dc   :  { %1527 = vmatpush.bf16.msra.mxu2 %v2188_v45 }
 0x1e0   :  { %1528 = vmatpush.bf16.msra.mxu2 %v2180_v53  ;;  %v1438_v53 = vperm.slane %v1436_v51, 0 }
 0x216   :  { %v1298_v55 = vpop.f32.mrf.mxu1 }
 0x21e   :  { %v1300_v57 = vpop.f32.mrf.mxu1 }
 0x232   :  { %v2753_v58 = vpop.f32.mrf.mxu3 }
 0x236   :  { %v2755_v63 = vpop.f32.mrf.mxu1 }
 0x23a   :  { %v1326_v60 = vpop.f32.mrf.mxu3 }
 0x23b   :  { %v924_v60 = vperm.slane %v2760_v59, 2 }
 0x23e   :  { %v1352_v5 = vpop.f32.mrf.mxu1 }
 0x244   :  { %v1285_v13 = vpop.f32.mrf.mxu0 }
 0x245   :  { %v1286_v20 = vadd.f32 %v1285_v13, %v923_v6 }
 0x247   :  { %v1299_v18 = vadd.f32 %v1298_v55, %v1286_v20  ;;  %v2171_v55 = vld [vmem:[#allocation8] sm:$0xf] }
 0x248   :  { %v2172_v4 = vor.u32 %v2378_v56, %v2171_v55 }
 0x249   :  { %v2165_v25 = vmul.f32 -1.442695, %v1299_v18 }
 0x24a   :  { %v1259_v21 = vpop.f32.mrf.mxu2  ;;  %1529 = vmatpush.bf16.msra.mxu2 %v2172_v4 }
 0x24b   :  { %2423 = vpow2.f32 %v2165_v25  ;;  %v1260_v29 = vadd.f32 %v1259_v21, %v922_v19 }
 0x24c   :  { %v1287_v12 = vpop.f32.mrf.mxu0 }
 0x24d   :  { %v1273_v33 = vadd.f32 %v1272_v0, %v1260_v29  ;;  %v2181_v0 = vld [vmem:[#allocation8 + $0x18] sm:$0xf0] }
 0x24e   :  { %v2184_v61 = vor.u32 %v2379_v54, %v2181_v0  ;;  %v1439_v54 = vperm.slane %v1436_v51, 1 }
 0x24f   :  { %v2164_v32 = vmul.f32 -1.442695, %v1273_v33 }
 0x250   :  { %1541 = vmatpush.bf16.msra.mxu3 %v2184_v61 }
 0x251   :  { %v2424_v40 = vpop.eup %2423  ;;  %2425 = vpow2.f32 %v2164_v32 }
 0x252   :  { %v2764_v41 = vadd.f32 1.0, %v2424_v40  ;;  %v1261_v42 = vpop.f32.mrf.mxu2 }
 0x254   :  { %2427 = vrcp.f32 %v2764_v41  ;;  %v1337_v49 = vpop.f32.mrf.mxu0  ;;  %1542 = vmatpush.bf16.msra.mxu3 %v2176_v10  ;;  %v1392_v19 = vand.u32 2147483648, %v2764_v41  ;;  %vm1386_vm1 = vweird.f32 %v2764_v41  ;;  %v1390_v24 = vand.u32 2147483647, %v2764_v41 }
 0x255   :  { %v1338_v34 = vadd.f32 %v1337_v49, %v925_v1 }
 0x256   :  { %v1393_v27 = vor.u32 1.1754944e-38, %v1392_v19  ;;  %vm1391_vm5 = vcmp.eq.f32.partialorder %v1390_v24, 8.507059e+37 }
 0x257   :  { %v2426_v57 = vpop.eup %2425  ;;  %v1351_v16 = vadd.f32 %v2755_v63, %v1338_v34 }
 0x258   :  { %v1363_v62 = vadd.f32 1.0, %v2426_v57 }
 0x25a   :  { %v2428_v5 = vpop.eup %2427  ;;  %2429 = vrcp.f32 %v1363_v62  ;;  %v1311_v6 = vpop.f32.mrf.mxu2  ;;  %v1377_v25 = vand.u32 2147483648, %v1363_v62  ;;  %v1375_v63 = vand.u32 2147483647, %v1363_v62  ;;  %vm1371_vm4 = vweird.f32 %v1363_v62 }
 0x25b   :  { %v1382_v7 = vmul.f32 %v2428_v5, %v2764_v41  ;;  %v1312_v8 = vadd.f32 %v1311_v6, %v924_v60  ;;  %vm1387_vm0 = vweird.f32 %v2428_v5 }
 0x25c   :  { %v1339_v11 = vpop.f32.mrf.mxu0  ;;  %vm2775_vm2 = vmor %vm1386_vm1, %vm1387_vm0  ;;  %v1378_v31 = vor.u32 1.1754944e-38, %v1377_v25  ;;  %vm1376_vm7 = vcmp.eq.f32.partialorder %v1375_v63, 8.507059e+37 }
 0x25d   :  { %v1383_v13 = vsub.f32 1.0, %v1382_v7  ;;  %v1325_v14 = vadd.f32 %v2753_v58, %v1312_v8 }
 0x25f   :  { %v1384_v20 = vmul.f32 %v2428_v5, %v1383_v13  ;;  %v2166_v59 = vmul.f32 -1.442695, %v1325_v14 }
 0x260   :  { %v2430_v15 = vpop.eup %2429 }
 0x261   :  { %v1367_v17 = vmul.f32 %v2430_v15, %v1363_v62  ;;  %v1385_v18 = vadd.f32 %v2428_v5, %v1384_v20  ;;  %2431 = vpow2.f32 %v2166_v59  ;;  %vm1372_vm3 = vweird.f32 %v2430_v15 }
 0x262   :  { %v1313_v22 = vpop.f32.mrf.mxu2  ;;  %2433 = vtanh.f32 %v1351_v16  ;;  %vm1373_vm6 = vmor %vm1371_vm4, %vm1372_vm3 }
 0x263   :  { %v1368_v23 = vsub.f32 1.0, %v1367_v17  ;;  %v1389_v26 = vsel %vm2775_vm2, %v2428_v5, %v1385_v18 }
 0x264   :  { %v1394_v12 = vsel %vm1391_vm5, %v1393_v27, %v1389_v26 }
 0x265   :  { %v1369_v21 = vmul.f32 %v2430_v15, %v1368_v23  ;;  %v1412_v9 = vmul.f32 %v1394_v12, %v111_v30 }
 0x267   :  { %v2432_v28 = vpop.eup %2431  ;;  %v1370_v29 = vadd.f32 %v2430_v15, %v1369_v21 }
 0x268   :  { %v1365_v46 = vadd.f32 1.0, %v2432_v28  ;;  %v2434_v35 = vpop.eup %2433 }
 0x269   :  { %v1374_v33 = vsel %vm1373_vm6, %v2430_v15, %v1370_v29 }
 0x26a   :  { %v1379_v37 = vsel %vm1376_vm7, %v1378_v31, %v1374_v33  ;;  %2435 = vrcp.f32 %v1365_v46  ;;  %v1407_v41 = vand.u32 2147483648, %v1365_v46  ;;  %v1405_v43 = vand.u32 2147483647, %v1365_v46 }
 0x26b   :  { %v1413_v32 = vmul.f32 %v2434_v35, %v1379_v37  ;;  %vm1401_vm9 = vweird.f32 %v1365_v46 }
 0x26c   :  { %v1408_v45 = vor.u32 1.1754944e-38, %v1407_v41  ;;  %vm1406_vm11 = vcmp.eq.f32.partialorder %v1405_v43, 8.507059e+37 }
 0x26d   :  { %v1414_v38 = vadd.f32 %v1413_v32, %v1412_v9 }
 0x26f   :  { %2168 = vst [vmem:[%s2808_s12 + $0x8] sm:$0xff] %v1414_v38  ;;  %2437 = vtanh.f32 %v1414_v38 }
 0x270   :  { %v2436_v39 = vpop.eup %2435 }
 0x271   :  { %v1397_v36 = vmul.f32 %v2436_v39, %v1365_v46  ;;  %vm1402_vm8 = vweird.f32 %v2436_v39 }
 0x272   :  { %vm1403_vm10 = vmor %vm1401_vm9, %vm1402_vm8 }
 0x273   :  { %v1398_v40 = vsub.f32 1.0, %v1397_v36 }
 0x275   :  { %v1399_v42 = vmul.f32 %v2436_v39, %v1398_v40  ;;  %v2438_v48 = vpop.eup %2437 }
 0x277   :  { %v1400_v44 = vadd.f32 %v2436_v39, %v1399_v42 }
 0x279   :  { %v1404_v47 = vsel %vm1403_vm10, %v2436_v39, %v1400_v44 }
 0x27a   :  { %v1409_v52 = vsel %vm1406_vm11, %v1408_v45, %v1404_v47 }
 0x27b   :  { %v1416_v49 = vmul.f32 %v2438_v48, %v1409_v52 }
 0x27d   :  { %2167 = vst [vmem:[%s2807_s11 + $0x8] sm:$0xff] %v1416_v49  ;;  %v1419_v50 = vpack.c.bf16 %v1416_v49, %v1416_v49 }
 0x27f   :  { %1530 = vmatmul.bf16.vlgmr.msra.gmra.mxu2 %v1419_v50  ;;  %1543 = vmatmul.bf16.vlgmr.msra.gmra.mxu3 %v1419_v50 }
 0x302   :  { %v1531_v0 = vpop.f32.mrf.mxu2  ;;  %v1544_v55 = vpop.f32.mrf.mxu3 }
 0x303   :  { %v1532_v56 = vadd.f32 %v1531_v0, %v1438_v53  ;;  %v1545_v57 = vadd.f32 %v1544_v55, %v1439_v54 }
 0x305   :  { %1548 = vst [vmem:[#allocation10] sm:$0xff] %v1532_v56 }
 0x306   :  { %1549 = vst [vmem:[#allocation10 + $0x8] sm:$0xff] %v1545_v57 }
 0x307   :  { %1560 = dma.vmem_to_hbm [thread:$0]  %s1556_s24, 256, %s1558_s4, [#allocation4]  }
 0x30a   :  { %v1533_v60 = vpop.f32.mrf.mxu2  ;;  %v1546_v61 = vpop.f32.mrf.mxu3 }
 0x30b   :  { %2565 = dma.done.wait [#allocation4], 256  }
 0x30c   :  { %2566 = vsyncadd [#allocation4], 4294967040 }
 0x30d   :  { %1573 = vsyncpa [#allocation3], 1 }
 0x30e   :  { %1574 = vsyncpa [#allocation6], 1 }
 0x30f   :  { %1575 = vsyncpa [#allocation9], 1 }
 0x310   :  { %1576 = vsyncpa [#allocation4], 1 }

</bundles_post_ra>
